<compile_context>
chip_gen: v7x
topology: tpu7x:2x2x1
jax: 0.10.0
libtpu: 0.0.40
codegen_flags: <defaults>
</compile_context>

<pallas_src>
import functools

import jax
import jax.numpy as jnp
import numpy as np
from jax import lax
from jax.experimental import pallas as pl
from jax.experimental.pallas import tpu as pltpu


# ----------------------------------------------------------------------------
# Fused kernel: L2 norm -> corr (MXU) -> gaussian_normalize/softmax ->
# attention sums -> attention-weighted pooling.  One grid step per query.
# ----------------------------------------------------------------------------
def fused_cca_kernel(masks_ref, spt_ref, qry_ref, out_ref, *,
                     way, hw, num_levels, inv_temp_attn):
    s_f = spt_ref[...]                  # (way*HW, C) f32, mean-centered support
    q_f = qry_ref[0]                    # (HW,     C) f32, mean-centered query

    inv_levels = 1.0 / float(num_levels)
    n = jnp.float32(hw)
    inv_hw = 1.0 / n
    gn_eps = jnp.float32(1e-5)

    # Per-level FeatureL2Norm over channels (eps=1e-6).  Channel segments are
    # selected with 0/1 lane masks -> full-width lane reductions, no sub-128
    # lane slicing, and no separate bf16 input copies from HBM.
    def l2norm_bf16(x):
        xx = x * x
        scale = None
        for l in range(num_levels):                        # static unroll
            m = masks_ref[l:l + 1, :]                      # (1, C)
            ssq = jnp.sum(xx * m, axis=1, keepdims=True)   # (rows, 1)
            part = lax.rsqrt(ssq + 1e-6) * m               # (rows, C)
            scale = part if scale is None else scale + part
        return (x * scale).astype(jnp.bfloat16)

    s_n = l2norm_bf16(s_f)              # (way*HW, C) bf16
    q_n = l2norm_bf16(q_f)              # (HW,     C) bf16

    dn = (((1,), (1,)), ((), ()))       # contract the channel (lane) dim

    # ---- corr_s path: gaussian_normalize + softmax along support spatial ----
    # corr rows = (way, support pos), cols = query pos.  The mean over
    # hyperpixel levels of the per-level correlations collapses into this one
    # K = C_total contraction because the L2 norm is per level.
    corr = lax.dot_general(s_n, q_n, dn,
                           preferred_element_type=jnp.float32) * inv_levels
    s_rows = []
    for w in range(way):                                   # static unroll
        c_w = corr[w * hw:(w + 1) * hw, :]                 # (HW_s, HW_q)
        mean = jnp.sum(c_w, axis=0, keepdims=True) * inv_hw
        var = (jnp.sum(c_w * c_w, axis=0, keepdims=True) - n * mean * mean) / (n - 1.0)
        # softmax over axis 0 is invariant to the per-column mean shift -> drop it
        z = c_w * (lax.rsqrt(var + gn_eps) * inv_temp_attn)
        z = z - jnp.max(z, axis=0, keepdims=True)
        e = jnp.exp(z)
        p = e * pl.reciprocal(jnp.sum(e, axis=0, keepdims=True), approx=True)
        attn_s = jnp.sum(p, axis=1, keepdims=True)         # (HW_s, 1)
        s_f_w = s_f[w * hw:(w + 1) * hw, :]                # (HW_s, C)
        # VPU broadcast-multiply + sublane reduce (no N=1 MXU matvec);
        # result is already a lane-dense (1, C) row.
        s_rows.append(jnp.sum(s_f_w * attn_s, axis=0, keepdims=True) * inv_hw)

    # ---- corr_q path: gaussian_normalize + softmax along query spatial ----
    # Use the transposed correlation (query rows, (way, support) cols) so the
    # per-(way, support-pos) stats are plain per-column stats and attn_q comes
    # out as a natural column aligned with the (HW, C) query features.
    corr_t = lax.dot_general(q_n, s_n, dn,
                             preferred_element_type=jnp.float32) * inv_levels
    mean = jnp.sum(corr_t, axis=0, keepdims=True) * inv_hw
    var = (jnp.sum(corr_t * corr_t, axis=0, keepdims=True) - n * mean * mean) / (n - 1.0)
    z = corr_t * (lax.rsqrt(var + gn_eps) * inv_temp_attn)
    z = z - jnp.max(z, axis=0, keepdims=True)
    e = jnp.exp(z)
    p = e * pl.reciprocal(jnp.sum(e, axis=0, keepdims=True), approx=True)

    col = lax.broadcasted_iota(jnp.int32, (1, way * hw), 1)
    q_rows = []
    for w in range(way):                                   # static unroll
        sel = jnp.logical_and(col >= w * hw, col < (w + 1) * hw)
        attn_q = jnp.sum(jnp.where(sel, p, 0.0), axis=1, keepdims=True)  # (HW_q, 1)
        q_rows.append(jnp.sum(q_f * attn_q, axis=0, keepdims=True) * inv_hw)

    # single lane-dense store: rows [0, way) = pooled support, [way, 2*way) = pooled query
    out_ref[0] = jnp.concatenate(s_rows + q_rows, axis=0)  # (2*way, C)


def fused_corr_attn_pool(spt_hwc_flat, qry_hwc, level_masks, *, way, hw,
                         num_levels, temperature_attn):
    """spt_hwc_flat: (way*HW, C) f32; qry_hwc: (num_qry, HW, C) f32.
    Returns pooled_s, pooled_q with shape (num_qry, way, C)."""
    num_qry = qry_hwc.shape[0]
    C = spt_hwc_flat.shape[1]

    kern = functools.partial(
        fused_cca_kernel, way=way, hw=hw, num_levels=num_levels,
        inv_temp_attn=1.0 / float(temperature_attn))

    out = pl.pallas_call(
        kern,
        out_shape=jax.ShapeDtypeStruct((num_qry, 2 * way, C), jnp.float32),
        grid=(num_qry,),
        in_specs=[
            pl.BlockSpec((num_levels, C), lambda q: (0, 0)),   # level masks (fetched once)
            pl.BlockSpec((way * hw, C), lambda q: (0, 0)),     # all supports (fetched once)
            pl.BlockSpec((1, hw, C), lambda q: (q, 0, 0)),     # one query per step
        ],
        out_specs=pl.BlockSpec((1, 2 * way, C), lambda q: (q, 0, 0)),
        compiler_params=pltpu.CompilerParams(
            dimension_semantics=("parallel",)),                # v7x: shard queries over both TCs
    )(level_masks, spt_hwc_flat, qry_hwc)

    return out[:, :way, :], out[:, way:, :]


# ----------------------------------------------------------------------------
# Method.cca forward (mode='cca')
# ----------------------------------------------------------------------------
def method_cca_forward(spt, qry, params, cfg):
    """spt: (1, way, C_total, fs, fs), qry: (num_qry, C_total, fs, fs)."""
    fs = cfg["feature_size"]
    HW = fs * fs
    level_channels = cfg["level_channels"]
    L = len(level_channels)

    # spt.squeeze(0) + normalize_feature (subtract per-sample channel mean)
    spt = spt[0]
    spt = spt - spt.mean(axis=1, keepdims=True)
    qry = qry - qry.mean(axis=1, keepdims=True)
    way, c_total = spt.shape[0], spt.shape[1]
    num_qry = qry.shape[0]
    B = num_qry * way

    # channels-last (lane-dense) feature layout for the kernel
    spt_hwc = spt.reshape(way, c_total, HW).transpose(0, 2, 1)       # (way, HW, C)
    qry_hwc = qry.reshape(num_qry, c_total, HW).transpose(0, 2, 1)   # (num_qry, HW, C)

    offsets = np.concatenate([[0], np.cumsum(level_channels)]).astype(np.int64)
    # 0/1 lane masks selecting each hyperpixel level's channel block
    masks_np = np.zeros((L, c_total), np.float32)
    for i in range(L):
        masks_np[i, offsets[i]:offsets[i + 1]] = 1.0
    level_masks = jnp.asarray(masks_np)

    # self.proj[i] linear projections (decoder inputs): tiny (Cout=proj_dim)
    # matmuls -> plain XLA einsum.
    spt_projs, qry_projs = [], []
    for i in range(L):
        w_i, b_i = params["proj_w"][i], params["proj_b"][i]
        s_seg = spt_hwc[:, :, offsets[i]:offsets[i + 1]]              # (way, HW, c)
        q_seg = qry_hwc[:, :, offsets[i]:offsets[i + 1]]              # (num_qry, HW, c)
        spt_projs.append(jnp.einsum('wpc,cd->wpd', s_seg, w_i) + b_i)
        qry_projs.append(jnp.einsum('qpc,cd->qpd', q_seg, w_i) + b_i)
    spt_feats_proj = jnp.stack(spt_projs, axis=1)                     # (way, L, HW, P)
    qry_feats_proj = jnp.stack(qry_projs, axis=1)                     # (num_qry, L, HW, P)
    spt_feats_proj = jnp.broadcast_to(
        spt_feats_proj[None], (num_qry,) + spt_feats_proj.shape).reshape(B, L, HW, -1)
    qry_feats_proj = jnp.broadcast_to(
        qry_feats_proj[:, None], (num_qry, way) + qry_feats_proj.shape[1:]).reshape(B, L, HW, -1)

    # TODO(synk): TransformerAggregator decoder is an external module (not defined
    # in models/method.py); stand in with the mean over hyperpixel levels, which
    # collapses into the single fused correlation contraction below.

    # Fused Pallas kernel: corr -> level mean -> gaussian_normalize/softmax ->
    # attention sums -> attention-weighted spatial mean pooling.
    pooled_s, pooled_q = fused_corr_attn_pool(
        spt_hwc.reshape(way * HW, c_total), qry_hwc, level_masks,
        way=way, hw=HW, num_levels=L,
        temperature_attn=cfg["temperature_attn"])
    # pooled_*: (num_qry, way, C_total)

    # F.cosine_similarity(dim=-1, eps=1e-8)
    eps = 1e-8
    num = jnp.sum(pooled_s * pooled_q, axis=-1)
    den = (jnp.maximum(jnp.linalg.norm(pooled_s, axis=-1), eps)
           * jnp.maximum(jnp.linalg.norm(pooled_q, axis=-1), eps))
    similarity_matrix = (num / den) / cfg["temperature"]

    # training-branch auxiliary head: self.fc(qry.mean([-1, -2]))  (tiny -> XLA)
    qry_pooled = qry.mean(axis=(-1, -2))                              # (num_qry, C_total)
    logits = qry_pooled @ params["fc_w"] + params["fc_b"]

    return similarity_matrix, logits, spt_feats_proj, qry_feats_proj


# ----------------------------------------------------------------------------
# main
# ----------------------------------------------------------------------------
if __name__ == "__main__":
    # Configuration mirroring Method.__init__ (args.hyperpixel_ids etc.)
    all_channels = [64] + [64] * 2 + [128] * 2 + [256] * 2 + [512] * 2
    hyperpixel_ids = [2, 4]                       # -> channels [64, 128]
    level_channels = [all_channels[i] for i in hyperpixel_ids]
    cfg = dict(
        feature_size=8,                           # TPU-friendly small spatial size
        feature_proj_dim=8,
        level_channels=level_channels,
        num_class=5,
        temperature=0.2,
        temperature_attn=5.0,
    )
    c_total = sum(level_channels)                 # encoder_dim
    way, num_qry = 2, 2
    fs = cfg["feature_size"]

    key = jax.random.PRNGKey(0)
    k_spt, k_qry, k_fw, k_fb, *k_proj = jax.random.split(key, 4 + 2 * len(level_channels))

    params = dict(
        proj_w=[0.05 * jax.random.normal(k_proj[2 * i], (c, cfg["feature_proj_dim"]), jnp.float32)
                for i, c in enumerate(level_channels)],
        proj_b=[0.01 * jax.random.normal(k_proj[2 * i + 1], (cfg["feature_proj_dim"],), jnp.float32)
                for i, c in enumerate(level_channels)],
        fc_w=0.05 * jax.random.normal(k_fw, (c_total, cfg["num_class"]), jnp.float32),
        fc_b=0.01 * jax.random.normal(k_fb, (cfg["num_class"],), jnp.float32),
    )

    spt = jax.random.normal(k_spt, (1, way, c_total, fs, fs), jnp.float32)
    qry = jax.random.normal(k_qry, (num_qry, c_total, fs, fs), jnp.float32)

    fwd = jax.jit(functools.partial(method_cca_forward, cfg=cfg))
    sim, logits, spt_proj, qry_proj = fwd(spt, qry, params)
    jax.block_until_ready((sim, logits, spt_proj, qry_proj))

    assert sim.shape == (num_qry, way)
    assert logits.shape == (num_qry, cfg["num_class"])
    assert spt_proj.shape == (num_qry * way, len(level_channels), fs * fs, cfg["feature_proj_dim"])
    assert qry_proj.shape == (num_qry * way, len(level_channels), fs * fs, cfg["feature_proj_dim"])
    assert bool(jnp.all(jnp.isfinite(sim))) and bool(jnp.all(jnp.isfinite(logits)))
    print("KERNEL_OK")
</pallas_src>

<mosaic_0001>
module attributes {stable_mosaic.version = 11 : i64} {
  func.func @fused_cca_kernel(%arg0: i32, %arg1: memref<2x192xf32, #tpu.memory_space<vmem>>, %arg2: memref<128x192xf32, #tpu.memory_space<vmem>>, %arg3: memref<1x64x192xf32, #tpu.memory_space<vmem>>, %arg4: memref<1x4x192xf32, #tpu.memory_space<vmem>>) attributes {dimension_semantics = [#tpu.dimension_semantics<parallel>], iteration_bounds = array<i64: 2>, scalar_prefetch = 0 : i64, scratch_operands = 0 : i64, tpu.core_type = #tpu.core_type<tc>, window_params = [{pipeline_mode = #tpu.pipeline_mode<synchronous>, transform_indices = @transform_0, window_bounds = array<i64: 2, 192>}, {pipeline_mode = #tpu.pipeline_mode<synchronous>, transform_indices = @transform_1, window_bounds = array<i64: 128, 192>}, {transform_indices = @transform_2, window_bounds = array<i64: 1, 64, 192>}, {transform_indices = @transform_3, window_bounds = array<i64: 1, 4, 192>}]} {
    %c0 = arith.constant 0 : index
    %c0_0 = arith.constant 0 : index
    %0 = vector.load %arg2[%c0, %c0_0] : memref<128x192xf32, #tpu.memory_space<vmem>>, vector<128x192xf32>
    %c0_1 = arith.constant 0 : index
    %c0_2 = arith.constant 0 : index
    %c0_3 = arith.constant 0 : index
    %1 = vector.load %arg3[%c0_1, %c0_2, %c0_3] : memref<1x64x192xf32, #tpu.memory_space<vmem>>, vector<1x64x192xf32>
    %2 = vector.shape_cast %1 : vector<1x64x192xf32> to vector<64x192xf32>
    %cst = arith.constant 1.000000e+00 : f32
    %cst_4 = arith.constant 6.400000e+01 : f32
    %3 = arith.divf %cst, %cst_4 : f32
    %4 = arith.mulf %0, %0 : vector<128x192xf32>
    %c0_5 = arith.constant 0 : index
    %c0_6 = arith.constant 0 : index
    %5 = vector.load %arg1[%c0_5, %c0_6] : memref<2x192xf32, #tpu.memory_space<vmem>>, vector<1x192xf32>
    %6 = vector.broadcast %5 : vector<1x192xf32> to vector<128x192xf32>
    %7 = arith.mulf %4, %6 : vector<128x192xf32>
    %cst_7 = arith.constant dense<0.000000e+00> : vector<128xf32>
    %8 = vector.multi_reduction <add>, %7, %cst_7 [1] : vector<128x192xf32> to vector<128xf32>
    %9 = vector.shape_cast %8 : vector<128xf32> to vector<128x1xf32>
    %cst_8 = arith.constant 9.99999997E-7 : f32
    %10 = vector.broadcast %cst_8 : f32 to vector<128x1xf32>
    %11 = arith.addf %9, %10 : vector<128x1xf32>
    %12 = math.rsqrt %11 : vector<128x1xf32>
    %13 = vector.broadcast %12 : vector<128x1xf32> to vector<128x192xf32>
    %14 = vector.broadcast %5 : vector<1x192xf32> to vector<128x192xf32>
    %15 = arith.mulf %13, %14 : vector<128x192xf32>
    %c1 = arith.constant 1 : index
    %c0_9 = arith.constant 0 : index
    %16 = vector.load %arg1[%c1, %c0_9] : memref<2x192xf32, #tpu.memory_space<vmem>>, vector<1x192xf32>
    %17 = vector.broadcast %16 : vector<1x192xf32> to vector<128x192xf32>
    %18 = arith.mulf %4, %17 : vector<128x192xf32>
    %cst_10 = arith.constant dense<0.000000e+00> : vector<128xf32>
    %19 = vector.multi_reduction <add>, %18, %cst_10 [1] : vector<128x192xf32> to vector<128xf32>
    %20 = vector.shape_cast %19 : vector<128xf32> to vector<128x1xf32>
    %cst_11 = arith.constant 9.99999997E-7 : f32
    %21 = vector.broadcast %cst_11 : f32 to vector<128x1xf32>
    %22 = arith.addf %20, %21 : vector<128x1xf32>
    %23 = math.rsqrt %22 : vector<128x1xf32>
    %24 = vector.broadcast %23 : vector<128x1xf32> to vector<128x192xf32>
    %25 = vector.broadcast %16 : vector<1x192xf32> to vector<128x192xf32>
    %26 = arith.mulf %24, %25 : vector<128x192xf32>
    %27 = arith.addf %15, %26 : vector<128x192xf32>
    %28 = arith.mulf %0, %27 : vector<128x192xf32>
    %29 = arith.truncf %28 : vector<128x192xf32> to vector<128x192xbf16>
    %30 = arith.mulf %2, %2 : vector<64x192xf32>
    %c0_12 = arith.constant 0 : index
    %c0_13 = arith.constant 0 : index
    %31 = vector.load %arg1[%c0_12, %c0_13] : memref<2x192xf32, #tpu.memory_space<vmem>>, vector<1x192xf32>
    %32 = vector.broadcast %31 : vector<1x192xf32> to vector<64x192xf32>
    %33 = arith.mulf %30, %32 : vector<64x192xf32>
    %cst_14 = arith.constant dense<0.000000e+00> : vector<64xf32>
    %34 = vector.multi_reduction <add>, %33, %cst_14 [1] : vector<64x192xf32> to vector<64xf32>
    %35 = vector.shape_cast %34 : vector<64xf32> to vector<64x1xf32>
    %cst_15 = arith.constant 9.99999997E-7 : f32
    %36 = vector.broadcast %cst_15 : f32 to vector<64x1xf32>
    %37 = arith.addf %35, %36 : vector<64x1xf32>
    %38 = math.rsqrt %37 : vector<64x1xf32>
    %39 = vector.broadcast %38 : vector<64x1xf32> to vector<64x192xf32>
    %40 = vector.broadcast %31 : vector<1x192xf32> to vector<64x192xf32>
    %41 = arith.mulf %39, %40 : vector<64x192xf32>
    %c1_16 = arith.constant 1 : index
    %c0_17 = arith.constant 0 : index
    %42 = vector.load %arg1[%c1_16, %c0_17] : memref<2x192xf32, #tpu.memory_space<vmem>>, vector<1x192xf32>
    %43 = vector.broadcast %42 : vector<1x192xf32> to vector<64x192xf32>
    %44 = arith.mulf %30, %43 : vector<64x192xf32>
    %cst_18 = arith.constant dense<0.000000e+00> : vector<64xf32>
    %45 = vector.multi_reduction <add>, %44, %cst_18 [1] : vector<64x192xf32> to vector<64xf32>
    %46 = vector.shape_cast %45 : vector<64xf32> to vector<64x1xf32>
    %cst_19 = arith.constant 9.99999997E-7 : f32
    %47 = vector.broadcast %cst_19 : f32 to vector<64x1xf32>
    %48 = arith.addf %46, %47 : vector<64x1xf32>
    %49 = math.rsqrt %48 : vector<64x1xf32>
    %50 = vector.broadcast %49 : vector<64x1xf32> to vector<64x192xf32>
    %51 = vector.broadcast %42 : vector<1x192xf32> to vector<64x192xf32>
    %52 = arith.mulf %50, %51 : vector<64x192xf32>
    %53 = arith.addf %41, %52 : vector<64x192xf32>
    %54 = arith.mulf %2, %53 : vector<64x192xf32>
    %55 = arith.truncf %54 : vector<64x192xf32> to vector<64x192xbf16>
    %cst_20 = arith.constant dense<0.000000e+00> : vector<128x64xf32>
    %56 = tpu.matmul %29, %55, %cst_20 {dimension_numbers = #tpu.dot_dimension_numbers<[1], [1], [0], [0], [0, 0, 1, 0], [], []>} : vector<128x192xbf16>, vector<64x192xbf16>, vector<128x64xf32> -> vector<128x64xf32>
    %cst_21 = arith.constant 5.000000e-01 : f32
    %57 = vector.broadcast %cst_21 : f32 to vector<128x64xf32>
    %58 = arith.mulf %56, %57 : vector<128x64xf32>
    %59 = vector.extract_strided_slice %58 {offsets = [0, 0], sizes = [64, 64], strides = [1, 1]} : vector<128x64xf32> to vector<64x64xf32>
    %cst_22 = arith.constant dense<0.000000e+00> : vector<64xf32>
    %60 = vector.multi_reduction <add>, %59, %cst_22 [0] : vector<64x64xf32> to vector<64xf32>
    %61 = vector.shape_cast %60 : vector<64xf32> to vector<1x64xf32>
    %62 = vector.broadcast %3 : f32 to vector<1x64xf32>
    %63 = arith.mulf %61, %62 : vector<1x64xf32>
    %64 = arith.mulf %59, %59 : vector<64x64xf32>
    %cst_23 = arith.constant dense<0.000000e+00> : vector<64xf32>
    %65 = vector.multi_reduction <add>, %64, %cst_23 [0] : vector<64x64xf32> to vector<64xf32>
    %66 = vector.shape_cast %65 : vector<64xf32> to vector<1x64xf32>
    %cst_24 = arith.constant 6.400000e+01 : f32
    %67 = vector.broadcast %cst_24 : f32 to vector<1x64xf32>
    %68 = arith.mulf %67, %63 : vector<1x64xf32>
    %69 = arith.mulf %68, %63 : vector<1x64xf32>
    %70 = arith.subf %66, %69 : vector<1x64xf32>
    %cst_25 = arith.constant 6.400000e+01 : f32
    %cst_26 = arith.constant 1.000000e+00 : f32
    %71 = arith.subf %cst_25, %cst_26 : f32
    %72 = vector.broadcast %71 : f32 to vector<1x64xf32>
    %73 = arith.divf %70, %72 : vector<1x64xf32>
    %cst_27 = arith.constant 9.99999974E-6 : f32
    %74 = vector.broadcast %cst_27 : f32 to vector<1x64xf32>
    %75 = arith.addf %73, %74 : vector<1x64xf32>
    %76 = math.rsqrt %75 : vector<1x64xf32>
    %cst_28 = arith.constant 2.000000e-01 : f32
    %77 = vector.broadcast %cst_28 : f32 to vector<1x64xf32>
    %78 = arith.mulf %76, %77 : vector<1x64xf32>
    %79 = vector.broadcast %78 : vector<1x64xf32> to vector<64x64xf32>
    %80 = arith.mulf %59, %79 : vector<64x64xf32>
    %cst_29 = arith.constant dense<0xFF800000> : vector<64xf32>
    %81 = vector.multi_reduction <maximumf>, %80, %cst_29 [0] : vector<64x64xf32> to vector<64xf32>
    %82 = vector.shape_cast %81 : vector<64xf32> to vector<1x64xf32>
    %83 = vector.broadcast %82 : vector<1x64xf32> to vector<64x64xf32>
    %84 = arith.subf %80, %83 : vector<64x64xf32>
    %85 = math.exp %84 : vector<64x64xf32>
    %cst_30 = arith.constant dense<0.000000e+00> : vector<64xf32>
    %86 = vector.multi_reduction <add>, %85, %cst_30 [0] : vector<64x64xf32> to vector<64xf32>
    %87 = vector.shape_cast %86 : vector<64xf32> to vector<1x64xf32>
    %88 = tpu.reciprocal %87 {approx = true} : vector<1x64xf32> -> vector<1x64xf32>
    %89 = vector.broadcast %88 : vector<1x64xf32> to vector<64x64xf32>
    %90 = arith.mulf %85, %89 : vector<64x64xf32>
    %cst_31 = arith.constant dense<0.000000e+00> : vector<64xf32>
    %91 = vector.multi_reduction <add>, %90, %cst_31 [1] : vector<64x64xf32> to vector<64xf32>
    %92 = vector.shape_cast %91 : vector<64xf32> to vector<64x1xf32>
    %93 = vector.extract_strided_slice %0 {offsets = [0, 0], sizes = [64, 192], strides = [1, 1]} : vector<128x192xf32> to vector<64x192xf32>
    %94 = vector.broadcast %92 : vector<64x1xf32> to vector<64x192xf32>
    %95 = arith.mulf %93, %94 : vector<64x192xf32>
    %cst_32 = arith.constant dense<0.000000e+00> : vector<192xf32>
    %96 = vector.multi_reduction <add>, %95, %cst_32 [0] : vector<64x192xf32> to vector<192xf32>
    %97 = vector.shape_cast %96 : vector<192xf32> to vector<1x192xf32>
    %98 = vector.broadcast %3 : f32 to vector<1x192xf32>
    %99 = arith.mulf %97, %98 : vector<1x192xf32>
    %100 = vector.extract_strided_slice %58 {offsets = [64, 0], sizes = [64, 64], strides = [1, 1]} : vector<128x64xf32> to vector<64x64xf32>
    %cst_33 = arith.constant dense<0.000000e+00> : vector<64xf32>
    %101 = vector.multi_reduction <add>, %100, %cst_33 [0] : vector<64x64xf32> to vector<64xf32>
    %102 = vector.shape_cast %101 : vector<64xf32> to vector<1x64xf32>
    %103 = vector.broadcast %3 : f32 to vector<1x64xf32>
    %104 = arith.mulf %102, %103 : vector<1x64xf32>
    %105 = arith.mulf %100, %100 : vector<64x64xf32>
    %cst_34 = arith.constant dense<0.000000e+00> : vector<64xf32>
    %106 = vector.multi_reduction <add>, %105, %cst_34 [0] : vector<64x64xf32> to vector<64xf32>
    %107 = vector.shape_cast %106 : vector<64xf32> to vector<1x64xf32>
    %cst_35 = arith.constant 6.400000e+01 : f32
    %108 = vector.broadcast %cst_35 : f32 to vector<1x64xf32>
    %109 = arith.mulf %108, %104 : vector<1x64xf32>
    %110 = arith.mulf %109, %104 : vector<1x64xf32>
    %111 = arith.subf %107, %110 : vector<1x64xf32>
    %cst_36 = arith.constant 6.400000e+01 : f32
    %cst_37 = arith.constant 1.000000e+00 : f32
    %112 = arith.subf %cst_36, %cst_37 : f32
    %113 = vector.broadcast %112 : f32 to vector<1x64xf32>
    %114 = arith.divf %111, %113 : vector<1x64xf32>
    %cst_38 = arith.constant 9.99999974E-6 : f32
    %115 = vector.broadcast %cst_38 : f32 to vector<1x64xf32>
    %116 = arith.addf %114, %115 : vector<1x64xf32>
    %117 = math.rsqrt %116 : vector<1x64xf32>
    %cst_39 = arith.constant 2.000000e-01 : f32
    %118 = vector.broadcast %cst_39 : f32 to vector<1x64xf32>
    %119 = arith.mulf %117, %118 : vector<1x64xf32>
    %120 = vector.broadcast %119 : vector<1x64xf32> to vector<64x64xf32>
    %121 = arith.mulf %100, %120 : vector<64x64xf32>
    %cst_40 = arith.constant dense<0xFF800000> : vector<64xf32>
    %122 = vector.multi_reduction <maximumf>, %121, %cst_40 [0] : vector<64x64xf32> to vector<64xf32>
    %123 = vector.shape_cast %122 : vector<64xf32> to vector<1x64xf32>
    %124 = vector.broadcast %123 : vector<1x64xf32> to vector<64x64xf32>
    %125 = arith.subf %121, %124 : vector<64x64xf32>
    %126 = math.exp %125 : vector<64x64xf32>
    %cst_41 = arith.constant dense<0.000000e+00> : vector<64xf32>
    %127 = vector.multi_reduction <add>, %126, %cst_41 [0] : vector<64x64xf32> to vector<64xf32>
    %128 = vector.shape_cast %127 : vector<64xf32> to vector<1x64xf32>
    %129 = tpu.reciprocal %128 {approx = true} : vector<1x64xf32> -> vector<1x64xf32>
    %130 = vector.broadcast %129 : vector<1x64xf32> to vector<64x64xf32>
    %131 = arith.mulf %126, %130 : vector<64x64xf32>
    %cst_42 = arith.constant dense<0.000000e+00> : vector<64xf32>
    %132 = vector.multi_reduction <add>, %131, %cst_42 [1] : vector<64x64xf32> to vector<64xf32>
    %133 = vector.shape_cast %132 : vector<64xf32> to vector<64x1xf32>
    %134 = vector.extract_strided_slice %0 {offsets = [64, 0], sizes = [64, 192], strides = [1, 1]} : vector<128x192xf32> to vector<64x192xf32>
    %135 = vector.broadcast %133 : vector<64x1xf32> to vector<64x192xf32>
    %136 = arith.mulf %134, %135 : vector<64x192xf32>
    %cst_43 = arith.constant dense<0.000000e+00> : vector<192xf32>
    %137 = vector.multi_reduction <add>, %136, %cst_43 [0] : vector<64x192xf32> to vector<192xf32>
    %138 = vector.shape_cast %137 : vector<192xf32> to vector<1x192xf32>
    %139 = vector.broadcast %3 : f32 to vector<1x192xf32>
    %140 = arith.mulf %138, %139 : vector<1x192xf32>
    %cst_44 = arith.constant dense<0.000000e+00> : vector<64x128xf32>
    %141 = tpu.matmul %55, %29, %cst_44 {dimension_numbers = #tpu.dot_dimension_numbers<[1], [1], [0], [0], [0, 0, 1, 0], [], []>} : vector<64x192xbf16>, vector<128x192xbf16>, vector<64x128xf32> -> vector<64x128xf32>
    %cst_45 = arith.constant 5.000000e-01 : f32
    %142 = vector.broadcast %cst_45 : f32 to vector<64x128xf32>
    %143 = arith.mulf %141, %142 : vector<64x128xf32>
    %cst_46 = arith.constant dense<0.000000e+00> : vector<128xf32>
    %144 = vector.multi_reduction <add>, %143, %cst_46 [0] : vector<64x128xf32> to vector<128xf32>
    %145 = vector.shape_cast %144 : vector<128xf32> to vector<1x128xf32>
    %146 = vector.broadcast %3 : f32 to vector<1x128xf32>
    %147 = arith.mulf %145, %146 : vector<1x128xf32>
    %148 = arith.mulf %143, %143 : vector<64x128xf32>
    %cst_47 = arith.constant dense<0.000000e+00> : vector<128xf32>
    %149 = vector.multi_reduction <add>, %148, %cst_47 [0] : vector<64x128xf32> to vector<128xf32>
    %150 = vector.shape_cast %149 : vector<128xf32> to vector<1x128xf32>
    %cst_48 = arith.constant 6.400000e+01 : f32
    %151 = vector.broadcast %cst_48 : f32 to vector<1x128xf32>
    %152 = arith.mulf %151, %147 : vector<1x128xf32>
    %153 = arith.mulf %152, %147 : vector<1x128xf32>
    %154 = arith.subf %150, %153 : vector<1x128xf32>
    %cst_49 = arith.constant 6.400000e+01 : f32
    %cst_50 = arith.constant 1.000000e+00 : f32
    %155 = arith.subf %cst_49, %cst_50 : f32
    %156 = vector.broadcast %155 : f32 to vector<1x128xf32>
    %157 = arith.divf %154, %156 : vector<1x128xf32>
    %cst_51 = arith.constant 9.99999974E-6 : f32
    %158 = vector.broadcast %cst_51 : f32 to vector<1x128xf32>
    %159 = arith.addf %157, %158 : vector<1x128xf32>
    %160 = math.rsqrt %159 : vector<1x128xf32>
    %cst_52 = arith.constant 2.000000e-01 : f32
    %161 = vector.broadcast %cst_52 : f32 to vector<1x128xf32>
    %162 = arith.mulf %160, %161 : vector<1x128xf32>
    %163 = vector.broadcast %162 : vector<1x128xf32> to vector<64x128xf32>
    %164 = arith.mulf %143, %163 : vector<64x128xf32>
    %cst_53 = arith.constant dense<0xFF800000> : vector<128xf32>
    %165 = vector.multi_reduction <maximumf>, %164, %cst_53 [0] : vector<64x128xf32> to vector<128xf32>
    %166 = vector.shape_cast %165 : vector<128xf32> to vector<1x128xf32>
    %167 = vector.broadcast %166 : vector<1x128xf32> to vector<64x128xf32>
    %168 = arith.subf %164, %167 : vector<64x128xf32>
    %169 = math.exp %168 : vector<64x128xf32>
    %cst_54 = arith.constant dense<0.000000e+00> : vector<128xf32>
    %170 = vector.multi_reduction <add>, %169, %cst_54 [0] : vector<64x128xf32> to vector<128xf32>
    %171 = vector.shape_cast %170 : vector<128xf32> to vector<1x128xf32>
    %172 = tpu.reciprocal %171 {approx = true} : vector<1x128xf32> -> vector<1x128xf32>
    %173 = vector.broadcast %172 : vector<1x128xf32> to vector<64x128xf32>
    %174 = arith.mulf %169, %173 : vector<64x128xf32>
    %175 = tpu.iota {dimensions = array<i32: 1>} : vector<1x128xi32>
    %c0_i32 = arith.constant 0 : i32
    %176 = vector.broadcast %c0_i32 : i32 to vector<1x128xi32>
    %177 = arith.cmpi sge, %175, %176 : vector<1x128xi32>
    %c64_i32 = arith.constant 64 : i32
    %178 = vector.broadcast %c64_i32 : i32 to vector<1x128xi32>
    %179 = arith.cmpi slt, %175, %178 : vector<1x128xi32>
    %180 = arith.andi %177, %179 : vector<1x128xi1>
    %cst_55 = arith.constant 0.000000e+00 : f32
    %181 = vector.shape_cast %180 : vector<1x128xi1> to vector<1x128xi1>
    %182 = vector.broadcast %181 : vector<1x128xi1> to vector<64x128xi1>
    %183 = vector.broadcast %cst_55 : f32 to vector<64x128xf32>
    %184 = arith.select %182, %174, %183 : vector<64x128xi1>, vector<64x128xf32>
    %cst_56 = arith.constant dense<0.000000e+00> : vector<64xf32>
    %185 = vector.multi_reduction <add>, %184, %cst_56 [1] : vector<64x128xf32> to vector<64xf32>
    %186 = vector.shape_cast %185 : vector<64xf32> to vector<64x1xf32>
    %187 = vector.broadcast %186 : vector<64x1xf32> to vector<64x192xf32>
    %188 = arith.mulf %2, %187 : vector<64x192xf32>
    %cst_57 = arith.constant dense<0.000000e+00> : vector<192xf32>
    %189 = vector.multi_reduction <add>, %188, %cst_57 [0] : vector<64x192xf32> to vector<192xf32>
    %190 = vector.shape_cast %189 : vector<192xf32> to vector<1x192xf32>
    %191 = vector.broadcast %3 : f32 to vector<1x192xf32>
    %192 = arith.mulf %190, %191 : vector<1x192xf32>
    %c64_i32_58 = arith.constant 64 : i32
    %193 = vector.broadcast %c64_i32_58 : i32 to vector<1x128xi32>
    %194 = arith.cmpi sge, %175, %193 : vector<1x128xi32>
    %c128_i32 = arith.constant 128 : i32
    %195 = vector.broadcast %c128_i32 : i32 to vector<1x128xi32>
    %196 = arith.cmpi slt, %175, %195 : vector<1x128xi32>
    %197 = arith.andi %194, %196 : vector<1x128xi1>
    %cst_59 = arith.constant 0.000000e+00 : f32
    %198 = vector.shape_cast %197 : vector<1x128xi1> to vector<1x128xi1>
    %199 = vector.broadcast %198 : vector<1x128xi1> to vector<64x128xi1>
    %200 = vector.broadcast %cst_59 : f32 to vector<64x128xf32>
    %201 = arith.select %199, %174, %200 : vector<64x128xi1>, vector<64x128xf32>
    %cst_60 = arith.constant dense<0.000000e+00> : vector<64xf32>
    %202 = vector.multi_reduction <add>, %201, %cst_60 [1] : vector<64x128xf32> to vector<64xf32>
    %203 = vector.shape_cast %202 : vector<64xf32> to vector<64x1xf32>
    %204 = vector.broadcast %203 : vector<64x1xf32> to vector<64x192xf32>
    %205 = arith.mulf %2, %204 : vector<64x192xf32>
    %cst_61 = arith.constant dense<0.000000e+00> : vector<192xf32>
    %206 = vector.multi_reduction <add>, %205, %cst_61 [0] : vector<64x192xf32> to vector<192xf32>
    %207 = vector.shape_cast %206 : vector<192xf32> to vector<1x192xf32>
    %208 = vector.broadcast %3 : f32 to vector<1x192xf32>
    %209 = arith.mulf %207, %208 : vector<1x192xf32>
    %210 = tpu.concatenate %99, %140, %192, %209 in 0 : vector<1x192xf32>, vector<1x192xf32>, vector<1x192xf32>, vector<1x192xf32> -> vector<4x192xf32>
    %c0_62 = arith.constant 0 : index
    %c0_63 = arith.constant 0 : index
    %c0_64 = arith.constant 0 : index
    %211 = vector.load %arg4[%c0_62, %c0_63, %c0_64] : memref<1x4x192xf32, #tpu.memory_space<vmem>>, vector<1x4x192xf32>
    %212 = vector.shape_cast %211 : vector<1x4x192xf32> to vector<4x192xf32>
    %213 = vector.shape_cast %210 : vector<4x192xf32> to vector<1x4x192xf32>
    tpu.vector_store %arg4[%c0_62, %c0_63, %c0_64], %213 {strides = array<i32>} : memref<1x4x192xf32, #tpu.memory_space<vmem>>, vector<1x4x192xf32>,
    return
  }
  func.func @transform_0(%arg0: i32) -> (i32, i32) {
    %c0_i32 = arith.constant 0 : i32
    %c0_i32_0 = arith.constant 0 : i32
    %c0_i32_1 = arith.constant 0 : i32
    return %c0_i32, %c0_i32_0 : i32, i32
  }
  func.func @transform_1(%arg0: i32) -> (i32, i32) {
    %c0_i32 = arith.constant 0 : i32
    %c0_i32_0 = arith.constant 0 : i32
    %c0_i32_1 = arith.constant 0 : i32
    return %c0_i32, %c0_i32_0 : i32, i32
  }
  func.func @transform_2(%arg0: i32) -> (i32, i32, i32) {
    %c0_i32 = arith.constant 0 : i32
    %c0_i32_0 = arith.constant 0 : i32
    %c0_i32_1 = arith.constant 0 : i32
    return %arg0, %c0_i32, %c0_i32_0 : i32, i32, i32
  }
  func.func @transform_3(%arg0: i32) -> (i32, i32, i32) {
    %c0_i32 = arith.constant 0 : i32
    %c0_i32_0 = arith.constant 0 : i32
    %c0_i32_1 = arith.constant 0 : i32
    return %arg0, %c0_i32, %c0_i32_0 : i32, i32, i32
  }
}

</mosaic_0001>

<bundles_post_ra>
// kernel: method_cca_forward.1
= control target key start
LH: loop header
LB: loop body
LE: loop exit
PB: predicated region body
PF: predicated region fallthrough
CT: control target
= control target key end

     0   :  { %s2174_s12 = smov 0   ;;  %s3548_s0 = inlined_call_operand.vmem [shape: f32[2,192], index: 0, kind: input, shape index: {}]   ;;  %s3549_s1 = inlined_call_operand.vmem [shape: f32[128,192], index: 1, kind: input, shape index: {}]   ;;  %s3550_s2 = inlined_call_operand.vmem [shape: f32[2,64,192], index: 2, kind: input, shape index: {}]   ;;  %s3551_s3 = inlined_call_operand.vmem [shape: f32[2,4,192], index: 3, kind: output, shape index: {}]  }
   0x1 LB: > { %s1896_s13 = sadd.s32 4294967295, %s2152_s12   ;;  %p1900_p0 = scmp.ge.s32.totalorder %s2152_s12, 1  ;;  %s2152_s12 = sphi %s2174_s12, %s13_s12  }
   0x2   : > { %p137_p1 = scmp.lt.s32.totalorder %s2152_s12, 3 }
   0x4   : > { %p138_p2 = pnand %p1900_p0, %p137_p1 }
   0x6   : > { %141 = sbr.rel (%p138_p2) target bundleno = 874 (0x36a), region = 32 }
   0xd   : > { %v2185_v0 = vld [vmem:[%s3549_s1 + $0x10] sm:$0xff]  ;;  %v2190_v1 = vld [vmem:[%s3549_s1 + $0x18] sm:$0xff]  ;;  %v3552_v2 = vlaneseq  ;;  %v2195_v3 = vld [vmem:[%s3549_s1] sm:$0xff]  ;;  %p161_p3 = scmp.lt.s32.totalorder %s1896_s13, 1  ;;  %vm296_vm0 = vcmask 523264   ;;  %vm1824_vm3 = vcmask 1040384  }
   0xe   : > { %v2200_v4 = vld [vmem:[%s3549_s1 + $0x8] sm:$0xff]  ;;  %v252_v5 = vld [vmem:[%s3548_s0] ss:$2 sm:$0x3]  ;;  %v222_v7 = vmul.f32 %v2185_v0, %v2185_v0  ;;  %v223_v8 = vmul.f32 %v2190_v1, %v2190_v1  ;;  %v220_v12 = vmul.f32 %v2195_v3, %v2195_v3  ;;  %v2294_v60 = vld [vmem:[%s3549_s1 + $0x38] sm:$0xff]  ;;  %vm1827_vm4 = vcmask 1041408  }
   0xf   : > { %v255_v6 = vshrl.u32 %v3552_v2, 7  ;;  %v1905_v9 = vld [vmem:[%s3548_s0 + $0x1] ss:$2 sm:$0x3]  ;;  %s3591_s13 = smov (!%p161_p3, %s1896_s13), 1  ;;  %v221_v13 = vmul.f32 %v2200_v4, %v2200_v4  ;;  %vm1830_vm5 = vcmask 1042432  }
  0x10   : > { %s1932_s26 = sshll.u32 %s3591_s13, 7  ;;  %s1933_s28 = sshll.u32 %s3591_s13, 3  ;;  %vm1837_vm6 = vcmask 1043456   ;;  %vm1838_vm7 = vcmask 523268  }
  0x11   : > { %v256_v10 = vsub.s32 0, %v255_v6  ;;  %v260_v11 = vsub.s32 1, %v255_v6  ;;  %s2231_s29 = scalar_lea.vmem %s3550_s2, %s1932_s26  ;;  %s170_s5 = scalar_lea.vmem %s3551_s3, %s1933_s28  ;;  %vm1839_vm8 = vmor %vm1838_vm7, %vm1837_vm6 }
  0x12   : > { %v2234_v18 = vld [vmem:[%s2231_s29] sm:$0xff]  ;;  %v2237_v19 = vld [vmem:[%s2231_s29 + $0x8] sm:$0xff]  ;;  %v2254_v32 = vld [vmem:[%s2231_s29 + $0x10] sm:$0xff] }
  0x13   : > { %v2220_v14 = vrot.slane %v252_v5, %v256_v10  ;;  %v2222_v15 = vrot.slane %v252_v5, %v260_v11  ;;  %v2224_v16 = vrot.slane %v1905_v9, %v256_v10  ;;  %v2226_v17 = vrot.slane %v1905_v9, %v260_v11  ;;  %v2259_v37 = vld [vmem:[%s2231_s29 + $0x18] sm:$0xff]  ;;  %v2267_v43 = vld [vmem:[%s2231_s29 + $0x30] sm:$0xff]  ;;  %v2279_v50 = vld [vmem:[%s2231_s29 + $0x20] sm:$0xff] }
  0x14   : > { %v678_v30 = vmul.f32 %v2234_v18, %v2234_v18  ;;  %v679_v31 = vmul.f32 %v2237_v19, %v2237_v19  ;;  %v2262_v38 = vld [vmem:[%s2231_s29 + $0x38] sm:$0xff]  ;;  %v680_v46 = vmul.f32 %v2254_v32, %v2254_v32  ;;  %v681_v48 = vmul.f32 %v2259_v37, %v2259_v37  ;;  %v2282_v51 = vld [vmem:[%s2231_s29 + $0x28] sm:$0xff] }
  0x15   : > { %v266_v20 = vmul.f32 %v2220_v14, %v222_v7  ;;  %v267_v21 = vmul.f32 %v2222_v15, %v223_v8  ;;  %v264_v22 = vmul.f32 %v2220_v14, %v220_v12  ;;  %v265_v23 = vmul.f32 %v2222_v15, %v221_v13  ;;  %v2304_v5 = vld [vmem:[%s3549_s1 + $0x28] sm:$0xff] }
  0x16   : > { %v440_v24 = vmul.f32 %v2224_v16, %v222_v7  ;;  %v441_v25 = vmul.f32 %v2226_v17, %v223_v8  ;;  %v438_v26 = vmul.f32 %v2224_v16, %v220_v12  ;;  %v439_v27 = vmul.f32 %v2226_v17, %v221_v13  ;;  %v2316_v12 = vld [vmem:[%s3549_s1 + $0x30] sm:$0xff] }
  0x17   : > { %v301_v28 = vsel %vm296_vm0, %v267_v21, 0.0  ;;  %v297_v29 = vsel %vm296_vm0, %v265_v23, 0.0  ;;  %v774_v41 = vmul.f32 %v678_v30, %v2224_v16  ;;  %v775_v42 = vmul.f32 %v679_v31, %v2226_v17 }
  0x18   : > { %v302_v33 = vadd.f32 %v301_v28, %v266_v20  ;;  %v298_v34 = vadd.f32 %v297_v29, %v264_v22  ;;  %v474_v35 = vsel %vm296_vm0, %v441_v25, 0.0  ;;  %v470_v36 = vsel %vm296_vm0, %v439_v27, 0.0 }
  0x19   : > { %v475_v39 = vadd.f32 %v474_v35, %v440_v24  ;;  %v471_v40 = vadd.f32 %v470_v36, %v438_v26  ;;  %v694_v44 = vmul.f32 %v678_v30, %v2220_v14  ;;  %v695_v45 = vmul.f32 %v679_v31, %v2222_v15  ;;  %v2325_v24 = vld [vmem:[%s3549_s1 + $0x20] sm:$0xff] }
  0x1a   : > { %303 = vadd.xlane.f32.xlu1 %v302_v33  ;;  %299 = vadd.xlane.f32.xlu0 %v298_v34  ;;  %v790_v47 = vsel %vm296_vm0, %v775_v42, 0.0  ;;  %v685_v49 = vmul.f32 %v2262_v38, %v2262_v38  ;;  %v776_v54 = vmul.f32 %v680_v46, %v2224_v16  ;;  %v684_v55 = vmul.f32 %v2267_v43, %v2267_v43 }
  0x1b   : > { %v791_v52 = vadd.f32 %v790_v47, %v774_v41  ;;  %v710_v53 = vsel %vm296_vm0, %v695_v45, 0.0  ;;  %v777_v57 = vmul.f32 %v681_v48, %v2226_v17  ;;  %v696_v58 = vmul.f32 %v680_v46, %v2220_v14  ;;  %v2343_v41 = vld [vmem:[%s2231_s29 + $0x48] sm:$0xff] }
  0x1c   : > { %v711_v56 = vadd.f32 %v710_v53, %v694_v44  ;;  %v697_v59 = vmul.f32 %v681_v48, %v2222_v15  ;;  %v701_v61 = vmul.f32 %v685_v49, %v2222_v15  ;;  %v682_v62 = vmul.f32 %v2279_v50, %v2279_v50  ;;  %v2352_v53 = vld [vmem:[%s2231_s29 + $0x50] sm:$0xff] }
  0x1d   : > { %v683_v63 = vmul.f32 %v2282_v51, %v2282_v51  ;;  %v794_v6 = vsel %vm296_vm0, %v777_v57, 0.0  ;;  %v227_v8 = vmul.f32 %v2294_v60, %v2294_v60  ;;  %v700_v9 = vmul.f32 %v684_v55, %v2220_v14 }
  0x1e   : > { %476 = vadd.xlane.f32.xlu1 %v475_v39  ;;  %472 = vadd.xlane.f32.xlu0 %v471_v40  ;;  %v714_v7 = vsel %vm296_vm0, %v697_v59, 0.0  ;;  %v781_v11 = vmul.f32 %v685_v49, %v2226_v17  ;;  %v225_v13 = vmul.f32 %v2304_v5, %v2304_v5  ;;  %v795_v20 = vadd.f32 %v794_v6, %v776_v54  ;;  %v2340_v40 = vld [vmem:[%s2231_s29 + $0x58] sm:$0xff] }
  0x1f   : > { %v699_v10 = vmul.f32 %v683_v63, %v2222_v15  ;;  %v715_v21 = vadd.f32 %v714_v7, %v696_v58  ;;  %v722_v22 = vsel %vm296_vm0, %v701_v61, 0.0  ;;  %v698_v23 = vmul.f32 %v682_v62, %v2220_v14 }
  0x20   : > { %v779_v26 = vmul.f32 %v683_v63, %v2226_v17  ;;  %v226_v27 = vmul.f32 %v2316_v12, %v2316_v12  ;;  %v723_v28 = vadd.f32 %v722_v22, %v700_v9  ;;  %v780_v29 = vmul.f32 %v684_v55, %v2224_v16  ;;  %v2357_v55 = vld [vmem:[%s2231_s29 + $0x40] sm:$0xff] }
  0x21   : > { %v718_v25 = vsel %vm296_vm0, %v699_v10, 0.0  ;;  %v778_v30 = vmul.f32 %v682_v62, %v2224_v16  ;;  %v224_v31 = vmul.f32 %v2325_v24, %v2325_v24  ;;  %v802_v34 = vsel %vm296_vm0, %v781_v11, 0.0  ;;  %v2379_v11 = vld [vmem:[%s3549_s1 + $0x48] sm:$0xff] }
  0x22   : > { %792 = vadd.xlane.f32.xlu1 %v791_v52  ;;  %712 = vadd.xlane.f32.xlu0 %v711_v56  ;;  %v719_v33 = vadd.f32 %v718_v25, %v698_v23  ;;  %v271_v35 = vmul.f32 %v2222_v15, %v227_v8  ;;  %v269_v36 = vmul.f32 %v2222_v15, %v225_v13  ;;  %v798_v39 = vsel %vm296_vm0, %v779_v26, 0.0  ;;  %v2389_v26 = vld [vmem:[%s3549_s1 + $0x50] sm:$0xff] }
  0x23   : > { %v803_v42 = vadd.f32 %v802_v34, %v780_v29  ;;  %v270_v44 = vmul.f32 %v2220_v14, %v226_v27  ;;  %v268_v45 = vmul.f32 %v2220_v14, %v224_v31  ;;  %v445_v46 = vmul.f32 %v2226_v17, %v227_v8  ;;  %v2372_v8 = vld [vmem:[%s3549_s1 + $0x58] sm:$0xff] }
  0x24   : > { %v799_v47 = vadd.f32 %v798_v39, %v778_v30  ;;  %v309_v48 = vsel %vm296_vm0, %v271_v35, 0.0  ;;  %v305_v49 = vsel %vm296_vm0, %v269_v36, 0.0  ;;  %v443_v52 = vmul.f32 %v2226_v17, %v225_v13 }
  0x25   : > { %v689_v54 = vmul.f32 %v2340_v40, %v2340_v40  ;;  %v687_v56 = vmul.f32 %v2343_v41, %v2343_v41  ;;  %v310_v57 = vadd.f32 %v309_v48, %v270_v44  ;;  %v306_v58 = vadd.f32 %v305_v49, %v268_v45  ;;  %v2412_v48 = vld [vmem:[%s2231_s29 + $0x78] sm:$0xff]  ;;  %v2415_v49 = vld [vmem:[%s2231_s29 + $0x68] sm:$0xff] }
  0x26   : > { %796 = vadd.xlane.f32.xlu1 %v795_v20  ;;  %716 = vadd.xlane.f32.xlu0 %v715_v21  ;;  %v444_v59 = vmul.f32 %v2224_v16, %v226_v27  ;;  %v442_v61 = vmul.f32 %v2224_v16, %v224_v31  ;;  %v482_v62 = vsel %vm296_vm0, %v445_v46, 0.0  ;;  %v478_v63 = vsel %vm296_vm0, %v443_v52, 0.0  ;;  %v2394_v27 = vld [vmem:[%s3549_s1 + $0x40] sm:$0xff] }
  0x27   : > { %v688_v6 = vmul.f32 %v2352_v53, %v2352_v53  ;;  %v686_v7 = vmul.f32 %v2357_v55, %v2357_v55  ;;  %v705_v9 = vmul.f32 %v689_v54, %v2222_v15  ;;  %v703_v10 = vmul.f32 %v687_v56, %v2222_v15 }
  0x28   : > { %v483_v13 = vadd.f32 %v482_v62, %v444_v59  ;;  %v479_v20 = vadd.f32 %v478_v63, %v442_v61  ;;  %v231_v21 = vmul.f32 %v2372_v8, %v2372_v8  ;;  %v785_v25 = vmul.f32 %v689_v54, %v2226_v17  ;;  %v2423_v62 = vld [vmem:[%s2231_s29 + $0x70] sm:$0xff] }
  0x29   : > { %v704_v22 = vmul.f32 %v688_v6, %v2220_v14  ;;  %v702_v23 = vmul.f32 %v686_v7, %v2220_v14  ;;  %v726_v29 = vsel %vm296_vm0, %v703_v10, 0.0  ;;  %v783_v30 = vmul.f32 %v687_v56, %v2226_v17 }
  0x2a   : > { %724 = vadd.xlane.f32.xlu1 %v723_v28  ;;  %720 = vadd.xlane.f32.xlu0 %v719_v33  ;;  %v730_v28 = vsel %vm296_vm0, %v705_v9, 0.0  ;;  %v229_v31 = vmul.f32 %v2379_v11, %v2379_v11  ;;  %v784_v33 = vmul.f32 %v688_v6, %v2224_v16  ;;  %v230_v34 = vmul.f32 %v2389_v26, %v2389_v26 }
  0x2b   : > { %v275_v35 = vmul.f32 %v2222_v15, %v231_v21  ;;  %v228_v36 = vmul.f32 %v2394_v27, %v2394_v27  ;;  %v731_v39 = vadd.f32 %v730_v28, %v704_v22  ;;  %v810_v44 = vsel %vm296_vm0, %v785_v25, 0.0 }
  0x2c   : > { %v782_v45 = vmul.f32 %v686_v7, %v2224_v16  ;;  %v806_v46 = vsel %vm296_vm0, %v783_v30, 0.0  ;;  %v811_v52 = vadd.f32 %v810_v44, %v784_v33  ;;  %v274_v54 = vmul.f32 %v2220_v14, %v230_v34  ;;  %v2429_v7 = vld [vmem:[%s2231_s29 + $0x60] sm:$0xff]  ;;  %v2451_v33 = vld [vmem:[%s3549_s1 + $0x68] sm:$0xff] }
  0x2d   : > { %v272_v56 = vmul.f32 %v2220_v14, %v228_v36  ;;  %v449_v59 = vmul.f32 %v2226_v17, %v231_v21  ;;  %v447_v61 = vmul.f32 %v2226_v17, %v229_v31  ;;  %v693_v6 = vmul.f32 %v2412_v48, %v2412_v48 }
  0x2e   : > { %804 = vadd.xlane.f32.xlu1 %v803_v42  ;;  %800 = vadd.xlane.f32.xlu0 %v799_v47  ;;  %v727_v42 = vadd.f32 %v726_v29, %v702_v23  ;;  %v273_v47 = vmul.f32 %v2222_v15, %v229_v31  ;;  %v691_v9 = vmul.f32 %v2415_v49, %v2415_v49  ;;  %v2444_v29 = vld [vmem:[%s3549_s1 + $0x78] sm:$0xff] }
  0x2f   : > { %v692_v21 = vmul.f32 %v2423_v62, %v2423_v62  ;;  %v490_v23 = vsel %vm296_vm0, %v449_v59, 0.0  ;;  %v486_v25 = vsel %vm296_vm0, %v447_v61, 0.0  ;;  %v690_v28 = vmul.f32 %v2429_v7, %v2429_v7 }
  0x30   : > { %v313_v63 = vsel %vm296_vm0, %v273_v47, 0.0  ;;  %v709_v30 = vmul.f32 %v693_v6, %v2222_v15  ;;  %v707_v31 = vmul.f32 %v691_v9, %v2222_v15  ;;  %v2467_v47 = vld [vmem:[%s3549_s1 + $0x60] sm:$0xff] }
  0x31   : > { %v314_v22 = vadd.f32 %v313_v63, %v272_v56  ;;  %v706_v44 = vmul.f32 %v690_v28, %v2220_v14  ;;  %v233_v56 = vmul.f32 %v2451_v33, %v2451_v33  ;;  %v786_v59 = vmul.f32 %v690_v28, %v2224_v16 }
  0x32   : > { %311 = vadd.xlane.f32.xlu1 %v310_v57  ;;  %307 = vadd.xlane.f32.xlu0 %v306_v58  ;;  %v807_v57 = vadd.f32 %v806_v46, %v782_v45  ;;  %v317_v58 = vsel %vm296_vm0, %v275_v35, 0.0  ;;  %v789_v45 = vmul.f32 %v693_v6, %v2226_v17  ;;  %v787_v46 = vmul.f32 %v691_v9, %v2226_v17 }
  0x33   : > { %v318_v10 = vadd.f32 %v317_v58, %v274_v54  ;;  %v734_v54 = vsel %vm296_vm0, %v707_v31, 0.0  ;;  %v788_v58 = vmul.f32 %v692_v21, %v2224_v16  ;;  %v232_v63 = vmul.f32 %v2467_v47, %v2467_v47  ;;  %v2498_v31 = vld [vmem:[%s3549_s1 + $0x90] sm:$0xff] }
  0x34   : > { %v735_v9 = vadd.f32 %v734_v54, %v706_v44  ;;  %v238_v54 = vmul.f32 %v2498_v31, %v2498_v31 }
  0x36   : > { %484 = vadd.xlane.f32.xlu1 %v483_v13  ;;  %480 = vadd.xlane.f32.xlu0 %v479_v20  ;;  %v448_v13 = vmul.f32 %v2224_v16, %v230_v34  ;;  %v446_v20 = vmul.f32 %v2224_v16, %v228_v36  ;;  %v708_v36 = vmul.f32 %v692_v21, %v2220_v14  ;;  %v2486_v21 = vld [vmem:[%s3549_s1 + $0x98] sm:$0xff] }
  0x37   : > { %v239_v44 = vmul.f32 %v2486_v21, %v2486_v21 }
  0x38   : > { %v491_v34 = vadd.f32 %v490_v23, %v448_v13  ;;  %v487_v35 = vadd.f32 %v486_v25, %v446_v20  ;;  %v814_v13 = vsel %vm296_vm0, %v787_v46, 0.0  ;;  %v277_v20 = vmul.f32 %v2222_v15, %v233_v56 }
  0x39   : > { %v815_v25 = vadd.f32 %v814_v13, %v786_v59 }
  0x3a   : > { %732 = vadd.xlane.f32.xlu1 %v731_v39  ;;  %728 = vadd.xlane.f32.xlu0 %v727_v42  ;;  %v2457_v39 = vld [vmem:[%s3549_s1 + $0x70] sm:$0xff]  ;;  %v235_v42 = vmul.f32 %v2444_v29, %v2444_v29  ;;  %v321_v46 = vsel %vm296_vm0, %v277_v20, 0.0 }
  0x3c   : > { %v279_v61 = vmul.f32 %v2222_v15, %v235_v42 }
  0x3e   : > { %812 = vadd.xlane.f32.xlu1 %v811_v52  ;;  %808 = vadd.xlane.f32.xlu0 %v807_v57  ;;  %v738_v52 = vsel %vm296_vm0, %v709_v30, 0.0  ;;  %v234_v57 = vmul.f32 %v2457_v39, %v2457_v39  ;;  %v276_v30 = vmul.f32 %v2220_v14, %v232_v63 }
  0x3f   : > { %v739_v6 = vadd.f32 %v738_v52, %v708_v36  ;;  %v451_v36 = vmul.f32 %v2226_v17, %v233_v56  ;;  %v450_v56 = vmul.f32 %v2224_v16, %v232_v63  ;;  %v2531_v63 = vld [vmem:[%s3549_s1 + $0xa8] sm:$0xff] }
  0x40   : > { %v278_v28 = vmul.f32 %v2220_v14, %v234_v57  ;;  %3566 = vst [vmem:[#allocation3_spill] sm:$0xff] %v2531_v63 }
  0x42   : > { %319 = vadd.xlane.f32.xlu1 %v318_v10  ;;  %315 = vadd.xlane.f32.xlu0 %v314_v22  ;;  %v818_v10 = vsel %vm296_vm0, %v789_v45, 0.0  ;;  %v2491_v22 = vld [vmem:[%s3549_s1 + $0x88] sm:$0xff]  ;;  %v2508_v45 = vld [vmem:[%s3549_s1 + $0x80] sm:$0xff] }
  0x43   : > { %v819_v23 = vadd.f32 %v818_v10, %v788_v58  ;;  %v237_v52 = vmul.f32 %v2491_v22, %v2491_v22  ;;  %v236_v59 = vmul.f32 %v2508_v45, %v2508_v45  ;;  %v283_v10 = vmul.f32 %v2222_v15, %v239_v44 }
  0x45   : > { %v281_v13 = vmul.f32 %v2222_v15, %v237_v52 }
  0x46   : > { %492 = vadd.xlane.f32.xlu1 %v491_v34  ;;  %488 = vadd.xlane.f32.xlu0 %v487_v35  ;;  %v325_v34 = vsel %vm296_vm0, %v279_v61, 0.0  ;;  %v453_v35 = vmul.f32 %v2226_v17, %v235_v42  ;;  %v452_v42 = vmul.f32 %v2224_v16, %v234_v57  ;;  %v322_v61 = vadd.f32 %v321_v46, %v276_v30  ;;  %v2526_v57 = vld [vmem:[%s3549_s1 + $0xb8] sm:$0xff] }
  0x47   : > { %v326_v58 = vadd.f32 %v325_v34, %v278_v28  ;;  %3565 = vst [vmem:[#allocation2_spill] sm:$0xff] %v2526_v57  ;;  %v280_v28 = vmul.f32 %v2220_v14, %v236_v59  ;;  %v333_v30 = vsel %vm296_vm0, %v283_v10, 0.0  ;;  %v457_v34 = vmul.f32 %v2226_v17, %v239_v44 }
  0x48   : > { %v243_v46 = vmul.f32 %v2526_v57, %v2526_v57  ;;  %v241_v44 = vmul.f32 %v2531_v63, %v2531_v63 }
  0x49   : > { %v506_v2 = vsel %vm296_vm0, %v457_v34, 0.0 }
  0x4a   : > { %740 = vadd.xlane.f32.xlu1 %v739_v6  ;;  %736 = vadd.xlane.f32.xlu0 %v735_v9  ;;  %v498_v6 = vsel %vm296_vm0, %v453_v35, 0.0  ;;  %v494_v9 = vsel %vm296_vm0, %v451_v36, 0.0  ;;  %v455_v35 = vmul.f32 %v2226_v17, %v237_v52  ;;  %v2541_v36 = vld [vmem:[%s3549_s1 + $0xb0] sm:$0xff]  ;;  %v456_v52 = vmul.f32 %v2224_v16, %v238_v54 }
  0x4b   : > { %v499_v20 = vadd.f32 %v498_v6, %v452_v42  ;;  %3567 = vst [vmem:[#allocation4_spill] sm:$0xff] %v2541_v36  ;;  %v2548_v42 = vld [vmem:[%s3549_s1 + $0xa0] sm:$0xff]  ;;  %v242_v6 = vmul.f32 %v2541_v36, %v2541_v36  ;;  %v287_v63 = vmul.f32 %v2222_v15, %v243_v46 }
  0x4c   : > { %3568 = vst [vmem:[#allocation5_spill] sm:$0xff] %v2548_v42 }
  0x4d   : > { %v341_v34 = vsel %vm296_vm0, %v287_v63, 0.0 }
  0x4e   : > { %820 = vadd.xlane.f32.xlu1 %v819_v23  ;;  %816 = vadd.xlane.f32.xlu0 %v815_v25  ;;  %v495_v23 = vadd.f32 %v494_v9, %v450_v56  ;;  %v282_v25 = vmul.f32 %v2220_v14, %v238_v54  ;;  %v240_v9 = vmul.f32 %v2548_v42, %v2548_v42  ;;  %v2581_v42 = vld [vmem:[%s3549_s1 + $0xd0] sm:$0xff] }
  0x4f   : > { %v285_v54 = vmul.f32 %v2222_v15, %v241_v44  ;;  %3571 = vst [vmem:[#allocation8_spill] sm:$0xff] %v2581_v42 }
  0x50   : > { %v334_v56 = vadd.f32 %v333_v30, %v282_v25  ;;  %v2571_v25 = vld [vmem:[%s3549_s1 + $0xc8] sm:$0xff]  ;;  %v284_v30 = vmul.f32 %v2220_v14, %v240_v9 }
  0x51   : > { %3570 = vst [vmem:[#allocation7_spill] sm:$0xff] %v2571_v25  ;;  %v245_v63 = vmul.f32 %v2571_v25, %v2571_v25 }
  0x52   : > { %327 = vadd.xlane.f32.xlu1 %v326_v58  ;;  %323 = vadd.xlane.f32.xlu0 %v322_v61  ;;  %v329_v58 = vsel %vm296_vm0, %v281_v13, 0.0  ;;  %v454_v61 = vmul.f32 %v2224_v16, %v236_v59  ;;  %v502_v13 = vsel %vm296_vm0, %v455_v35, 0.0  ;;  %v2566_v59 = vld [vmem:[%s3549_s1 + $0xd8] sm:$0xff]  ;;  %v461_v35 = vmul.f32 %v2226_v17, %v243_v46 }
  0x53   : > { %v330_v10 = vadd.f32 %v329_v58, %v280_v28  ;;  %3569 = vst [vmem:[#allocation6_spill] sm:$0xff] %v2566_v59  ;;  %v286_v28 = vmul.f32 %v2220_v14, %v242_v6  ;;  %v459_v58 = vmul.f32 %v2226_v17, %v241_v44  ;;  %v460_v46 = vmul.f32 %v2224_v16, %v242_v6 }
  0x54   : > { %v514_v36 = vsel %vm296_vm0, %v461_v35, 0.0  ;;  %v289_v6 = vmul.f32 %v2222_v15, %v245_v63 }
  0x55   : > { %v342_v44 = vadd.f32 %v341_v34, %v286_v28  ;;  %v2611_v28 = vld [vmem:[%s3549_s1 + $0xe8] sm:$0xff] }
  0x56   : > { %500 = vadd.xlane.f32.xlu1 %v499_v20  ;;  %496 = vadd.xlane.f32.xlu0 %v495_v23  ;;  %v507_v20 = vadd.f32 %v506_v2, %v456_v52  ;;  %v503_v23 = vadd.f32 %v502_v13, %v454_v61  ;;  %v247_v2 = vmul.f32 %v2566_v59, %v2566_v59  ;;  %v2588_v52 = vld [vmem:[%s3549_s1 + $0xc0] sm:$0xff] }
  0x57   : > { %3572 = vst [vmem:[#allocation9_spill] sm:$0xff] %v2588_v52  ;;  %v458_v61 = vmul.f32 %v2224_v16, %v240_v9  ;;  %v244_v13 = vmul.f32 %v2588_v52, %v2588_v52  ;;  %v2606_v9 = vld [vmem:[%s3549_s1 + $0xf8] sm:$0xff]  ;;  %3574 = vst [vmem:[#allocation11_spill] sm:$0xff] %v2611_v28  ;;  %v345_v52 = vsel %vm296_vm0, %v289_v6, 0.0 }
  0x58   : > { %v291_v25 = vmul.f32 %v2222_v15, %v247_v2  ;;  %3573 = vst [vmem:[#allocation10_spill] sm:$0xff] %v2606_v9 }
  0x59   : > { %v288_v35 = vmul.f32 %v2220_v14, %v244_v13 }
  0x5a   : > { %335 = vadd.xlane.f32.xlu1 %v334_v56  ;;  %331 = vadd.xlane.f32.xlu0 %v330_v10  ;;  %v337_v56 = vsel %vm296_vm0, %v285_v54, 0.0  ;;  %v246_v10 = vmul.f32 %v2581_v42, %v2581_v42  ;;  %v510_v54 = vsel %vm296_vm0, %v459_v58, 0.0  ;;  %v349_v34 = vsel %vm296_vm0, %v291_v25, 0.0  ;;  %v2629_v25 = vld [vmem:[%s3549_s1 + $0xe0] sm:$0xff] }
  0x5b   : > { %v338_v59 = vadd.f32 %v337_v56, %v284_v30  ;;  %v465_v58 = vmul.f32 %v2226_v17, %v247_v2  ;;  %v2620_v56 = vld [vmem:[%s3549_s1 + $0xf0] sm:$0xff]  ;;  %3576 = vst [vmem:[#allocation13_spill] sm:$0xff] %v2629_v25  ;;  %v249_v2 = vmul.f32 %v2611_v28, %v2611_v28  ;;  %v248_v6 = vmul.f32 %v2629_v25, %v2629_v25 }
  0x5c   : > { %v290_v30 = vmul.f32 %v2220_v14, %v246_v10  ;;  %3575 = vst [vmem:[#allocation12_spill] sm:$0xff] %v2620_v56 }
  0x5e   : > { %508 = vadd.xlane.f32.xlu1 %v507_v20  ;;  %504 = vadd.xlane.f32.xlu0 %v503_v23  ;;  %v515_v20 = vadd.f32 %v514_v36, %v460_v46  ;;  %v511_v23 = vadd.f32 %v510_v54, %v458_v61  ;;  %v463_v36 = vmul.f32 %v2226_v17, %v245_v63 }
  0x5f   : > { %v464_v46 = vmul.f32 %v2224_v16, %v246_v10  ;;  %v250_v61 = vmul.f32 %v2620_v56, %v2620_v56  ;;  %v350_v63 = vadd.f32 %v349_v34, %v290_v30  ;;  %v346_v54 = vadd.f32 %v345_v52, %v288_v35 }
  0x60   : > { %v518_v42 = vsel %vm296_vm0, %v463_v36, 0.0  ;;  %v293_v10 = vmul.f32 %v2222_v15, %v249_v2  ;;  %v467_v35 = vmul.f32 %v2226_v17, %v249_v2 }
  0x62   : > { %343 = vadd.xlane.f32.xlu1 %v342_v44  ;;  %339 = vadd.xlane.f32.xlu0 %v338_v59  ;;  %v251_v59 = vmul.f32 %v2606_v9, %v2606_v9  ;;  %v462_v44 = vmul.f32 %v2224_v16, %v244_v13  ;;  %v522_v9 = vsel %vm296_vm0, %v465_v58, 0.0  ;;  %v294_v13 = vmul.f32 %v2220_v14, %v250_v61 }
  0x63   : > { %v523_v56 = vadd.f32 %v522_v9, %v464_v46  ;;  %v353_v30 = vsel %vm296_vm0, %v293_v10, 0.0  ;;  %v468_v58 = vmul.f32 %v2224_v16, %v250_v61  ;;  %v526_v9 = vsel %vm296_vm0, %v467_v35, 0.0 }
  0x64   : > { %v295_v28 = vmul.f32 %v2222_v15, %v251_v59  ;;  %v469_v34 = vmul.f32 %v2226_v17, %v251_v59 }
  0x66   : > { %516 = vadd.xlane.f32.xlu1 %v515_v20  ;;  %512 = vadd.xlane.f32.xlu0 %v511_v23  ;;  %v519_v20 = vadd.f32 %v518_v42, %v462_v44  ;;  %v292_v23 = vmul.f32 %v2220_v14, %v248_v6  ;;  %v357_v52 = vsel %vm296_vm0, %v295_v28, 0.0  ;;  %v530_v42 = vsel %vm296_vm0, %v469_v34, 0.0 }
  0x67   : > { %v358_v36 = vadd.f32 %v357_v52, %v294_v13  ;;  %v531_v28 = vadd.f32 %v530_v42, %v468_v58 }
  0x68   : > { %v354_v25 = vadd.f32 %v353_v30, %v292_v23 }
  0x6a   : > { %351 = vadd.xlane.f32.xlu1 %v350_v63  ;;  %347 = vadd.xlane.f32.xlu0 %v346_v54  ;;  %v466_v63 = vmul.f32 %v2224_v16, %v248_v6 }
  0x6c   : > { %v527_v46 = vadd.f32 %v526_v9, %v466_v63 }
  0x6e   : > { %524 = vadd.xlane.f32.xlu1 %v523_v56  ;;  %520 = vadd.xlane.f32.xlu0 %v519_v20 }
  0x72   : > { %359 = vadd.xlane.f32.xlu1 %v358_v36  ;;  %355 = vadd.xlane.f32.xlu0 %v354_v25 }
  0x76   : > { %532 = vadd.xlane.f32.xlu1 %v531_v28  ;;  %528 = vadd.xlane.f32.xlu0 %v527_v46 }
  0xa7   : > { %v304_v59 = vpop.xlane.xlu1 %303  ;;  %v300_v2 = vpop.xlane.xlu0 %299 }
  0xa8   : > { %v362_v44 = vadd.f32 1e-06, %v304_v59  ;;  %v361_v61 = vadd.f32 1e-06, %v300_v2 }
  0xaa   : > { %1942 = vrsqrt.f32 %v362_v44 }
  0xab   : > { %v477_v56 = vpop.xlane.xlu1 %476  ;;  %v473_v54 = vpop.xlane.xlu0 %472  ;;  %1944 = vrsqrt.f32 %v361_v61 }
  0xac   : > { %v535_v10 = vadd.f32 1e-06, %v477_v56  ;;  %v534_v6 = vadd.f32 1e-06, %v473_v54 }
  0xae   : > { %1946 = vrsqrt.f32 %v535_v10 }
  0xaf   : > { %1948 = vrsqrt.f32 %v534_v6  ;;  %v793_v13 = vpop.xlane.xlu1 %792  ;;  %v713_v20 = vpop.xlane.xlu0 %712 }
  0xb0   : > { %v822_v23 = vadd.f32 1e-06, %v793_v13  ;;  %v742_v25 = vadd.f32 1e-06, %v713_v20 }
  0xb2   : > { %1950 = vrsqrt.f32 %v822_v23 }
  0xb3   : > { %1952 = vrsqrt.f32 %v742_v25  ;;  %v797_v52 = vpop.xlane.xlu1 %796  ;;  %v717_v30 = vpop.xlane.xlu0 %716 }
  0xb4   : > { %v823_v34 = vadd.f32 1e-06, %v797_v52  ;;  %v743_v35 = vadd.f32 1e-06, %v717_v30  ;;  %v1943_v58 = vpop.eup %1942 }
  0xb5   : > { %v1945_v36 = vpop.eup %1944  ;;  %v396_v59 = vmul.f32 %v1943_v58, %v2222_v15  ;;  %v395_v56 = vmul.f32 %v1943_v58, %v2220_v14 }
  0xb6   : > { %1954 = vrsqrt.f32 %v823_v34  ;;  %v394_v44 = vmul.f32 %v1945_v36, %v2222_v15  ;;  %v393_v6 = vmul.f32 %v1945_v36, %v2220_v14 }
  0xb7   : > { %1956 = vrsqrt.f32 %v743_v35  ;;  %v725_v63 = vpop.xlane.xlu1 %724  ;;  %v721_v42 = vpop.xlane.xlu0 %720 }
  0xb8   : > { %v1947_v9 = vpop.eup %1946  ;;  %v745_v28 = vadd.f32 1e-06, %v725_v63  ;;  %v744_v46 = vadd.f32 1e-06, %v721_v42 }
  0xb9   : > { %v1949_v2 = vpop.eup %1948  ;;  %v569_v61 = vmul.f32 %v1947_v9, %v2226_v17  ;;  %v568_v54 = vmul.f32 %v1947_v9, %v2224_v16 }
  0xba   : > { %1958 = vrsqrt.f32 %v745_v28  ;;  %v567_v10 = vmul.f32 %v1949_v2, %v2226_v17  ;;  %v566_v13 = vmul.f32 %v1949_v2, %v2224_v16 }
  0xbb   : > { %1960 = vrsqrt.f32 %v744_v46  ;;  %v805_v20 = vpop.xlane.xlu1 %804  ;;  %v801_v23 = vpop.xlane.xlu0 %800  ;;  %v601_v25 = vadd.f32 %v569_v61, %v396_v59  ;;  %v600_v52 = vadd.f32 %v568_v54, %v395_v56 }
  0xbc   : > { %v1951_v30 = vpop.eup %1950  ;;  %v825_v34 = vadd.f32 1e-06, %v805_v20  ;;  %v824_v35 = vadd.f32 1e-06, %v801_v23  ;;  %v599_v63 = vadd.f32 %v567_v10, %v394_v44  ;;  %v598_v42 = vadd.f32 %v566_v13, %v393_v6 }
  0xbd   : > { %v1953_v58 = vpop.eup %1952  ;;  %v633_v9 = vmul.f32 %v601_v25, %v2190_v1  ;;  %v632_v28 = vmul.f32 %v600_v52, %v2185_v0  ;;  %v839_v57 = vmul.f32 %v1951_v30, %v2226_v17  ;;  %v838_v36 = vmul.f32 %v1951_v30, %v2224_v16 }
  0xbe   : > { %1962 = vrsqrt.f32 %v825_v34  ;;  %v631_v46 = vmul.f32 %v599_v63, %v2200_v4  ;;  %v630_v59 = vmul.f32 %v598_v42, %v2195_v3  ;;  %v759_v2 = vmul.f32 %v1953_v58, %v2222_v15 }
  0xbf   : > { %1964 = vrsqrt.f32 %v824_v35  ;;  %v312_v61 = vpop.xlane.xlu1 %311  ;;  %v308_v44 = vpop.xlane.xlu0 %307  ;;  %v758_v56 = vmul.f32 %v1953_v58, %v2220_v14 }
  0xc0   : > { %v1955_v54 = vpop.eup %1954  ;;  %v364_v1 = vadd.f32 1e-06, %v312_v61  ;;  %v363_v10 = vadd.f32 1e-06, %v308_v44  ;;  %v663_v0 = vpack.c.bf16 %v633_v9, %v631_v46  ;;  %v2669_v6 = vpack.c.bf16 %v632_v28, %v630_v59 }
  0xc1   : > { %v1957_v13 = vpop.eup %1956  ;;  %v841_v20 = vmul.f32 %v1955_v54, %v2226_v17  ;;  %v855_v23 = vadd.f32 %v839_v57, %v759_v2  ;;  %v840_v4 = vmul.f32 %v1955_v54, %v2224_v16  ;;  %v854_v52 = vadd.f32 %v838_v36, %v758_v56 }
  0xc2   : > { %1966 = vrsqrt.f32 %v364_v1  ;;  %1910 = vmatprep.mubr.msk.bf16.mxu0 %vm296_vm0, %v663_v0  ;;  %1918 = vmatprep.subr.msk.bf16.mxu1 %vm296_vm0, %v663_v0  ;;  %v761_v3 = vmul.f32 %v1957_v13, %v2222_v15  ;;  %v760_v25 = vmul.f32 %v1957_v13, %v2220_v14 }
  0xc3   : > { %1968 = vrsqrt.f32 %v363_v10  ;;  %1479 = vmatpush1.bf16.xpose.msra.mxu1 %v2669_v6  ;;  %v485_v30 = vpop.xlane.xlu1 %484  ;;  %v481_v34 = vpop.xlane.xlu0 %480  ;;  %v871_v28 = vmul.f32 %v855_v23, %v2237_v19  ;;  %v870_v59 = vmul.f32 %v854_v52, %v2234_v18 }
  0xc4   : > { %v1959_v35 = vpop.eup %1958  ;;  %v537_v63 = vadd.f32 1e-06, %v485_v30  ;;  %v536_v57 = vadd.f32 1e-06, %v481_v34  ;;  %v857_v42 = vadd.f32 %v841_v20, %v761_v3  ;;  %v856_v58 = vadd.f32 %v840_v4, %v760_v25 }
  0xc5   : > { %v1961_v9 = vpop.eup %1960  ;;  %v765_v2 = vmul.f32 %v1959_v35, %v2222_v15  ;;  %v764_v18 = vmul.f32 %v1959_v35, %v2220_v14 }
  0xc6   : > { %1970 = vrsqrt.f32 %v537_v63  ;;  %v873_v46 = vmul.f32 %v857_v42, %v2259_v37  ;;  %v872_v36 = vmul.f32 %v856_v58, %v2254_v32  ;;  %v763_v19 = vmul.f32 %v1961_v9, %v2222_v15 }
  0xc7   : > { %1972 = vrsqrt.f32 %v536_v57  ;;  %v733_v61 = vpop.xlane.xlu1 %732  ;;  %v729_v44 = vpop.xlane.xlu0 %728  ;;  %v762_v23 = vmul.f32 %v1961_v9, %v2220_v14 }
  0xc8   : > { %v1963_v56 = vpop.eup %1962  ;;  %v747_v54 = vadd.f32 1e-06, %v733_v61  ;;  %v746_v1 = vadd.f32 1e-06, %v729_v44  ;;  %v887_v10 = vpack.c.bf16 %v873_v46, %v871_v28  ;;  %v2683_v0 = vpack.c.bf16 %v872_v36, %v870_v59 }
  0xc9   : > { %v1965_v13 = vpop.eup %1964  ;;  %v845_v37 = vmul.f32 %v1963_v56, %v2226_v17  ;;  %v844_v32 = vmul.f32 %v1963_v56, %v2224_v16 }
  0xca   : > { %v843_v20 = vmul.f32 %v1965_v13, %v2226_v17  ;;  %1974 = vrsqrt.f32 %v747_v54  ;;  %1906 = vmatprep.subr.msk.bf16.mxu0 %vm296_vm0, %v887_v10  ;;  %1926 = vmatprep.mubr.msk.bf16.mxu1 %vm296_vm0, %v887_v10  ;;  %v842_v4 = vmul.f32 %v1965_v13, %v2224_v16 }
  0xcb   : > { %1976 = vrsqrt.f32 %v746_v1  ;;  %931 = vmatpush1.bf16.xpose.msra.mxu0 %v2683_v0  ;;  %v813_v3 = vpop.xlane.xlu1 %812  ;;  %v809_v25 = vpop.xlane.xlu0 %808  ;;  %v861_v52 = vadd.f32 %v845_v37, %v765_v2  ;;  %v860_v30 = vadd.f32 %v844_v32, %v764_v18 }
  0xcc   : > { %v1967_v34 = vpop.eup %1966  ;;  %v827_v35 = vadd.f32 1e-06, %v813_v3  ;;  %v826_v63 = vadd.f32 1e-06, %v809_v25  ;;  %v859_v57 = vadd.f32 %v843_v20, %v763_v19  ;;  %v858_v42 = vadd.f32 %v842_v4, %v762_v23 }
  0xcd   : > { %v1969_v58 = vpop.eup %1968  ;;  %v877_v28 = vmul.f32 %v861_v52, %v2262_v38  ;;  %v876_v46 = vmul.f32 %v860_v30, %v2267_v43  ;;  %v400_v36 = vmul.f32 %v1967_v34, %v2222_v15 }
  0xce   : > { %1978 = vrsqrt.f32 %v827_v35  ;;  %v875_v9 = vmul.f32 %v859_v57, %v2282_v51  ;;  %v874_v59 = vmul.f32 %v858_v42, %v2279_v50  ;;  %v398_v43 = vmul.f32 %v1969_v58, %v2222_v15 }
  0xcf   : > { %1980 = vrsqrt.f32 %v826_v63  ;;  %v320_v2 = vpop.xlane.xlu1 %319  ;;  %v316_v61 = vpop.xlane.xlu0 %315  ;;  %v399_v51 = vmul.f32 %v1967_v34, %v2220_v14  ;;  %v397_v37 = vmul.f32 %v1969_v58, %v2220_v14 }
  0xd0   : > { %v1971_v44 = vpop.eup %1970  ;;  %v366_v56 = vadd.f32 1e-06, %v320_v2  ;;  %v365_v54 = vadd.f32 1e-06, %v316_v61  ;;  %v2700_v1 = vpack.c.bf16 %v877_v28, %v875_v9  ;;  %v2702_v10 = vpack.c.bf16 %v876_v46, %v874_v59 }
  0xd1   : > { %v1973_v38 = vpop.eup %1972  ;;  %v573_v13 = vmul.f32 %v1971_v44, %v2226_v17  ;;  %v572_v50 = vmul.f32 %v1971_v44, %v2224_v16 }
  0xd2   : > { %v571_v19 = vmul.f32 %v1973_v38, %v2226_v17  ;;  %1982 = vrsqrt.f32 %v366_v56  ;;  %1907 = vmatprep.subr.msk.bf16.mxu0 %vm296_vm0, %v2700_v1  ;;  %v570_v18 = vmul.f32 %v1973_v38, %v2224_v16 }
  0xd3   : > { %1984 = vrsqrt.f32 %v365_v54  ;;  %933 = vmatpush1.bf16.xpose.msra.mxu0 %v2702_v10  ;;  %v493_v32 = vpop.xlane.xlu1 %492  ;;  %v489_v20 = vpop.xlane.xlu0 %488  ;;  %v605_v23 = vadd.f32 %v573_v13, %v400_v36  ;;  %v604_v4 = vadd.f32 %v572_v50, %v399_v51 }
  0xd4   : > { %v1975_v3 = vpop.eup %1974  ;;  %v539_v25 = vadd.f32 1e-06, %v493_v32  ;;  %v538_v52 = vadd.f32 1e-06, %v489_v20  ;;  %v603_v30 = vadd.f32 %v571_v19, %v398_v43  ;;  %v602_v34 = vadd.f32 %v570_v18, %v397_v37 }
  0xd5   : > { %v1977_v35 = vpop.eup %1976  ;;  %v637_v63 = vmul.f32 %v605_v23, %v2294_v60  ;;  %v636_v57 = vmul.f32 %v604_v4, %v2316_v12  ;;  %v769_v28 = vmul.f32 %v1975_v3, %v2222_v15 }
  0xd6   : > { %1986 = vrsqrt.f32 %v539_v25  ;;  %v635_v42 = vmul.f32 %v603_v30, %v2304_v5  ;;  %v634_v58 = vmul.f32 %v602_v34, %v2325_v24  ;;  %v767_v12 = vmul.f32 %v1977_v35, %v2222_v15 }
  0xd7   : > { %1988 = vrsqrt.f32 %v538_v52  ;;  %v741_v46 = vpop.xlane.xlu1 %740  ;;  %v737_v9 = vpop.xlane.xlu0 %736  ;;  %v768_v5 = vmul.f32 %v1975_v3, %v2220_v14  ;;  %v766_v38 = vmul.f32 %v1977_v35, %v2220_v14 }
  0xd8   : > { %v1979_v59 = vpop.eup %1978  ;;  %v749_v36 = vadd.f32 1e-06, %v741_v46  ;;  %v748_v2 = vadd.f32 1e-06, %v737_v9  ;;  %v2719_v61 = vpack.c.bf16 %v637_v63, %v635_v42  ;;  %v2721_v44 = vpack.c.bf16 %v636_v57, %v634_v58 }
  0xd9   : > { %v1981_v60 = vpop.eup %1980  ;;  %v849_v56 = vmul.f32 %v1979_v59, %v2226_v17  ;;  %v848_v24 = vmul.f32 %v1979_v59, %v2224_v16 }
  0xda   : > { %v847_v54 = vmul.f32 %v1981_v60, %v2226_v17  ;;  %1990 = vrsqrt.f32 %v749_v36  ;;  %1919 = vmatprep.subr.msk.bf16.mxu1 %vm296_vm0, %v2719_v61  ;;  %v846_v43 = vmul.f32 %v1981_v60, %v2224_v16 }
  0xdb   : > { %1992 = vrsqrt.f32 %v748_v2  ;;  %1481 = vmatpush1.bf16.xpose.msra.mxu1 %v2721_v44  ;;  %v821_v13 = vpop.xlane.xlu1 %820  ;;  %v817_v51 = vpop.xlane.xlu0 %816  ;;  %v865_v50 = vadd.f32 %v849_v56, %v769_v28  ;;  %v864_v19 = vadd.f32 %v848_v24, %v768_v5 }
  0xdc   : > { %v1983_v37 = vpop.eup %1982  ;;  %v829_v18 = vadd.f32 1e-06, %v821_v13  ;;  %v828_v32 = vadd.f32 1e-06, %v817_v51  ;;  %v863_v20 = vadd.f32 %v847_v54, %v767_v12  ;;  %v862_v23 = vadd.f32 %v846_v43, %v766_v38 }
  0xdd   : > { %v1985_v4 = vpop.eup %1984  ;;  %v881_v3 = vmul.f32 %v865_v50, %v2340_v40  ;;  %v880_v25 = vmul.f32 %v864_v19, %v2352_v53  ;;  %v404_v34 = vmul.f32 %v1983_v37, %v2222_v15 }
  0xde   : > { %1994 = vrsqrt.f32 %v829_v18  ;;  %v879_v52 = vmul.f32 %v863_v20, %v2343_v41  ;;  %v878_v30 = vmul.f32 %v862_v23, %v2357_v55  ;;  %v402_v53 = vmul.f32 %v1985_v4, %v2222_v15 }
  0xdf   : > { %1996 = vrsqrt.f32 %v828_v32  ;;  %v328_v35 = vpop.xlane.xlu1 %327  ;;  %v324_v63 = vpop.xlane.xlu0 %323  ;;  %v403_v41 = vmul.f32 %v1983_v37, %v2220_v14  ;;  %v401_v36 = vmul.f32 %v1985_v4, %v2220_v14 }
  0xe0   : > { %v1987_v57 = vpop.eup %1986  ;;  %v368_v42 = vadd.f32 1e-06, %v328_v35  ;;  %v367_v58 = vadd.f32 1e-06, %v324_v63  ;;  %v2738_v28 = vpack.c.bf16 %v881_v3, %v879_v52  ;;  %v2740_v46 = vpack.c.bf16 %v880_v25, %v878_v30 }
  0xe1   : > { %v1989_v40 = vpop.eup %1988  ;;  %v577_v9 = vmul.f32 %v1987_v57, %v2226_v17  ;;  %v576_v55 = vmul.f32 %v1987_v57, %v2224_v16 }
  0xe2   : > { %v575_v59 = vmul.f32 %v1989_v40, %v2226_v17  ;;  %1998 = vrsqrt.f32 %v368_v42  ;;  %1908 = vmatprep.subr.msk.bf16.mxu0 %vm296_vm0, %v2738_v28  ;;  %v574_v2 = vmul.f32 %v1989_v40, %v2224_v16 }
  0xe3   : > { %2000 = vrsqrt.f32 %v367_v58  ;;  %935 = vmatpush1.bf16.xpose.msra.mxu0 %v2740_v46  ;;  %v501_v60 = vpop.xlane.xlu1 %500  ;;  %v497_v12 = vpop.xlane.xlu0 %496  ;;  %v609_v56 = vadd.f32 %v577_v9, %v404_v34  ;;  %v608_v5 = vadd.f32 %v576_v55, %v403_v41 }
  0xe4   : > { %v1991_v24 = vpop.eup %1990  ;;  %v541_v54 = vadd.f32 1e-06, %v501_v60  ;;  %v540_v38 = vadd.f32 1e-06, %v497_v12  ;;  %v607_v43 = vadd.f32 %v575_v59, %v402_v53  ;;  %v606_v13 = vadd.f32 %v574_v2, %v401_v36 }
  0xe5   : > { %v1993_v51 = vpop.eup %1992  ;;  %v641_v50 = vmul.f32 %v609_v56, %v2372_v8  ;;  %v640_v19 = vmul.f32 %v608_v5, %v2389_v26  ;;  %v773_v32 = vmul.f32 %v1991_v24, %v2222_v15 }
  0xe6   : > { %2002 = vrsqrt.f32 %v541_v54  ;;  %v639_v37 = vmul.f32 %v607_v43, %v2379_v11  ;;  %v638_v18 = vmul.f32 %v606_v13, %v2394_v27  ;;  %v771_v26 = vmul.f32 %v1993_v51, %v2222_v15 }
  0xe7   : > { %2004 = vrsqrt.f32 %v540_v38  ;;  %v336_v20 = vpop.xlane.xlu1 %335  ;;  %v332_v23 = vpop.xlane.xlu0 %331  ;;  %v772_v11 = vmul.f32 %v1991_v24, %v2220_v14  ;;  %v770_v63 = vmul.f32 %v1993_v51, %v2220_v14 }
  0xe8   : > { %v1995_v4 = vpop.eup %1994  ;;  %v370_v3 = vadd.f32 1e-06, %v336_v20  ;;  %v369_v25 = vadd.f32 1e-06, %v332_v23  ;;  %v2757_v52 = vpack.c.bf16 %v641_v50, %v639_v37  ;;  %v2759_v30 = vpack.c.bf16 %v640_v19, %v638_v18 }
  0xe9   : > { %v1997_v8 = vpop.eup %1996  ;;  %v853_v34 = vmul.f32 %v1995_v4, %v2226_v17  ;;  %v852_v27 = vmul.f32 %v1995_v4, %v2224_v16 }
  0xea   : > { %v851_v35 = vmul.f32 %v1997_v8, %v2226_v17  ;;  %2006 = vrsqrt.f32 %v370_v3  ;;  %1920 = vmatprep.subr.msk.bf16.mxu1 %vm296_vm0, %v2757_v52  ;;  %v850_v57 = vmul.f32 %v1997_v8, %v2224_v16 }
  0xeb   : > { %2008 = vrsqrt.f32 %v369_v25  ;;  %1483 = vmatpush1.bf16.xpose.msra.mxu1 %v2759_v30  ;;  %v509_v42 = vpop.xlane.xlu1 %508  ;;  %v505_v58 = vpop.xlane.xlu0 %504  ;;  %v869_v40 = vadd.f32 %v853_v34, %v773_v32  ;;  %v868_v53 = vadd.f32 %v852_v27, %v772_v11 }
  0xec   : > { %v1999_v9 = vpop.eup %1998  ;;  %v543_v41 = vadd.f32 1e-06, %v509_v42  ;;  %v542_v55 = vadd.f32 1e-06, %v505_v58  ;;  %v867_v59 = vadd.f32 %v851_v35, %v771_v26  ;;  %v866_v36 = vadd.f32 %v850_v57, %v770_v63 }
  0xed   : > { %v2001_v2 = vpop.eup %2000  ;;  %v885_v60 = vmul.f32 %v869_v40, %v2412_v48  ;;  %v884_v12 = vmul.f32 %v868_v53, %v2423_v62  ;;  %v408_v24 = vmul.f32 %v1999_v9, %v2222_v15 }
  0xee   : > { %2010 = vrsqrt.f32 %v543_v41  ;;  %v883_v56 = vmul.f32 %v867_v59, %v2415_v49  ;;  %v882_v5 = vmul.f32 %v866_v36, %v2429_v7  ;;  %v406_v62 = vmul.f32 %v2001_v2, %v2222_v15 }
  0xef   : > { %2012 = vrsqrt.f32 %v542_v55  ;;  %v344_v54 = vpop.xlane.xlu1 %343  ;;  %v340_v38 = vpop.xlane.xlu0 %339  ;;  %v407_v49 = vmul.f32 %v1999_v9, %v2220_v14  ;;  %v405_v32 = vmul.f32 %v2001_v2, %v2220_v14 }
  0xf0   : > { %v2003_v43 = vpop.eup %2002  ;;  %v372_v13 = vadd.f32 1e-06, %v344_v54  ;;  %v371_v51 = vadd.f32 1e-06, %v340_v38  ;;  %v2776_v50 = vpack.c.bf16 %v885_v60, %v883_v56  ;;  %v2778_v19 = vpack.c.bf16 %v884_v12, %v882_v5 }
  0xf1   : > { %v2005_v48 = vpop.eup %2004  ;;  %v581_v37 = vmul.f32 %v2003_v43, %v2226_v17  ;;  %v580_v7 = vmul.f32 %v2003_v43, %v2224_v16 }
  0xf2   : > { %v579_v18 = vmul.f32 %v2005_v48, %v2226_v17  ;;  %2014 = vrsqrt.f32 %v372_v13  ;;  %1909 = vmatprep.subr.msk.bf16.mxu0 %vm296_vm0, %v2776_v50  ;;  %v578_v20 = vmul.f32 %v2005_v48, %v2224_v16 }
  0xf3   : > { %2016 = vrsqrt.f32 %v371_v51  ;;  %937 = vmatpush1.bf16.xpose.msra.mxu0 %v2778_v19  ;;  %v517_v23 = vpop.xlane.xlu1 %516  ;;  %v513_v4 = vpop.xlane.xlu0 %512  ;;  %v613_v3 = vadd.f32 %v581_v37, %v408_v24  ;;  %v612_v25 = vadd.f32 %v580_v7, %v407_v49 }
  0xf4   : > { %v2007_v8 = vpop.eup %2006  ;;  %v545_v26 = vadd.f32 1e-06, %v517_v23  ;;  %v544_v34 = vadd.f32 1e-06, %v513_v4  ;;  %v611_v11 = vadd.f32 %v579_v18, %v406_v62  ;;  %v610_v27 = vadd.f32 %v578_v20, %v405_v32 }
  0xf5   : > { %v2009_v35 = vpop.eup %2008  ;;  %v645_v63 = vmul.f32 %v613_v3, %v2444_v29  ;;  %v644_v57 = vmul.f32 %v612_v25, %v2457_v39  ;;  %v412_v40 = vmul.f32 %v2007_v8, %v2222_v15 }
  0xf6   : > { %2018 = vrsqrt.f32 %v545_v26  ;;  %v643_v42 = vmul.f32 %v611_v11, %v2451_v33  ;;  %v642_v58 = vmul.f32 %v610_v27, %v2467_v47  ;;  %v410_v39 = vmul.f32 %v2009_v35, %v2222_v15 }
  0xf7   : > { %2020 = vrsqrt.f32 %v544_v34  ;;  %v352_v53 = vpop.xlane.xlu1 %351  ;;  %v348_v9 = vpop.xlane.xlu0 %347  ;;  %v411_v33 = vmul.f32 %v2007_v8, %v2220_v14  ;;  %v409_v56 = vmul.f32 %v2009_v35, %v2220_v14 }
  0xf8   : > { %v2011_v41 = vpop.eup %2010  ;;  %v374_v55 = vadd.f32 1e-06, %v352_v53  ;;  %v373_v59 = vadd.f32 1e-06, %v348_v9  ;;  %v2795_v36 = vpack.c.bf16 %v645_v63, %v643_v42  ;;  %v2797_v2 = vpack.c.bf16 %v644_v57, %v642_v58 }
  0xf9   : > { %v2013_v29 = vpop.eup %2012  ;;  %v585_v60 = vmul.f32 %v2011_v41, %v2226_v17  ;;  %v584_v47 = vmul.f32 %v2011_v41, %v2224_v16 }
  0xfa   : > { %v583_v12 = vmul.f32 %v2013_v29, %v2226_v17  ;;  %2022 = vrsqrt.f32 %v374_v55  ;;  %963 = vmatmul.mubr.bf16.vlgmr.msra.gmra.mrb[0].mxu0 %v2669_v6  ;;  %1921 = vmatprep.subr.msk.bf16.mxu1 %vm296_vm0, %v2795_v36  ;;  %v582_v5 = vmul.f32 %v2013_v29, %v2224_v16 }
  0xfb   : > { %2024 = vrsqrt.f32 %v373_v59  ;;  %1911 = vmatprep.mubr.msk.bf16.mxu0 %vm296_vm0, %v2719_v61  ;;  %1485 = vmatpush1.bf16.xpose.msra.mxu1 %v2797_v2  ;;  %v525_v24 = vpop.xlane.xlu1 %524  ;;  %v521_v54 = vpop.xlane.xlu0 %520  ;;  %v617_v38 = vadd.f32 %v585_v60, %v412_v40  ;;  %v616_v43 = vadd.f32 %v584_v47, %v411_v33  ;;  %v3577_v59 = vld [vmem:[#allocation2_spill] sm:$0xff]  ;;  %v3579_v33 = vld [vmem:[#allocation3_spill] sm:$0xff] }
  0xfc   : > { %v2015_v13 = vpop.eup %2014  ;;  %v547_v51 = vadd.f32 1e-06, %v525_v24  ;;  %v546_v6 = vadd.f32 1e-06, %v521_v54  ;;  %v615_v48 = vadd.f32 %v583_v12, %v410_v39  ;;  %v614_v62 = vadd.f32 %v582_v5, %v409_v56  ;;  %v3578_v39 = vld [vmem:[#allocation4_spill] sm:$0xff] }
  0xfd   : > { %v2017_v37 = vpop.eup %2016  ;;  %v649_v49 = vmul.f32 %v617_v38, %v2486_v21  ;;  %v648_v7 = vmul.f32 %v616_v43, %v2498_v31  ;;  %v416_v32 = vmul.f32 %v2015_v13, %v2222_v15 }
  0xfe   : > { %2026 = vrsqrt.f32 %v547_v51  ;;  %v647_v18 = vmul.f32 %v615_v48, %v2491_v22  ;;  %v646_v61 = vmul.f32 %v614_v62, %v2508_v45  ;;  %v414_v31 = vmul.f32 %v2017_v37, %v2222_v15 }
  0xff   : > { %2028 = vrsqrt.f32 %v546_v6  ;;  %v360_v20 = vpop.xlane.xlu1 %359  ;;  %v356_v23 = vpop.xlane.xlu0 %355  ;;  %v415_v22 = vmul.f32 %v2015_v13, %v2220_v14  ;;  %v413_v27 = vmul.f32 %v2017_v37, %v2220_v14 }
 0x100   : > { %v2019_v4 = vpop.eup %2018  ;;  %v376_v3 = vadd.f32 1e-06, %v360_v20  ;;  %v375_v25 = vadd.f32 1e-06, %v356_v23  ;;  %v2817_v8 = vpack.c.bf16 %v649_v49, %v647_v18  ;;  %v2819_v26 = vpack.c.bf16 %v648_v7, %v646_v61  ;;  %v3581_v23 = vld [vmem:[#allocation6_spill] sm:$0xff] }
 0x101   : > { %v2021_v21 = vpop.eup %2020  ;;  %v589_v34 = vmul.f32 %v2019_v4, %v2226_v17  ;;  %v588_v45 = vmul.f32 %v2019_v4, %v2224_v16 }
 0x102   : > { %v587_v11 = vmul.f32 %v2021_v21, %v2226_v17  ;;  %2030 = vrsqrt.f32 %v376_v3  ;;  %971 = vmatmul.mubr.bf16.gmra.mrb[4].mxu0 %v2721_v44  ;;  %1922 = vmatprep.subr.msk.bf16.mxu1 %vm296_vm0, %v2817_v8  ;;  %v586_v35 = vmul.f32 %v2021_v21, %v2224_v16  ;;  %v3582_v3 = vld [vmem:[#allocation8_spill] sm:$0xff] }
 0x103   : > { %2032 = vrsqrt.f32 %v375_v25  ;;  %1912 = vmatprep.mubr.msk.bf16.mxu0 %vm296_vm0, %v2757_v52  ;;  %1487 = vmatpush1.bf16.xpose.msra.mxu1 %v2819_v26  ;;  %v533_v63 = vpop.xlane.xlu1 %532  ;;  %v529_v57 = vpop.xlane.xlu0 %528  ;;  %v621_v42 = vadd.f32 %v589_v34, %v416_v32  ;;  %v620_v58 = vadd.f32 %v588_v45, %v415_v22  ;;  %v3580_v52 = vld [vmem:[#allocation5_spill] sm:$0xff]  ;;  %v3583_v25 = vld [vmem:[#allocation7_spill] sm:$0xff] }
 0x104   : > { %v2023_v40 = vpop.eup %2022  ;;  %v549_v53 = vadd.f32 1e-06, %v533_v63  ;;  %v548_v44 = vadd.f32 1e-06, %v529_v57  ;;  %v619_v9 = vadd.f32 %v587_v11, %v414_v31  ;;  %v618_v41 = vadd.f32 %v586_v35, %v413_v27  ;;  %v3584_v31 = vld [vmem:[#allocation9_spill] sm:$0xff] }
 0x105   : > { %v2025_v55 = vpop.eup %2024  ;;  %v653_v29 = vmul.f32 %v621_v42, %v3577_v59  ;;  %v652_v60 = vmul.f32 %v620_v58, %v3578_v39  ;;  %v420_v5 = vmul.f32 %v2023_v40, %v2222_v15  ;;  %v419_v51 = vmul.f32 %v2023_v40, %v2220_v14  ;;  %v3587_v39 = vld [vmem:[#allocation11_spill] sm:$0xff] }
 0x106   : > { %2034 = vrsqrt.f32 %v549_v53  ;;  %v651_v47 = vmul.f32 %v619_v9, %v3579_v33  ;;  %v650_v12 = vmul.f32 %v618_v41, %v3580_v52  ;;  %v418_v43 = vmul.f32 %v2025_v55, %v2222_v15 }
 0x107   : > { %2036 = vrsqrt.f32 %v548_v44  ;;  %v417_v62 = vmul.f32 %v2025_v55, %v2220_v14  ;;  %v3585_v55 = vld [vmem:[#allocation10_spill] sm:$0xff] }
 0x108   : > { %v2027_v56 = vpop.eup %2026  ;;  %v673_v24 = vpack.c.bf16 %v653_v29, %v651_v47  ;;  %v672_v54 = vpack.c.bf16 %v652_v60, %v650_v12  ;;  %v3586_v29 = vld [vmem:[#allocation12_spill] sm:$0xff]  ;;  %v3588_v60 = vld [vmem:[#allocation13_spill] sm:$0xff] }
 0x109   : > { %v2029_v38 = vpop.eup %2028  ;;  %v593_v13 = vmul.f32 %v2027_v56, %v2226_v17  ;;  %v592_v6 = vmul.f32 %v2027_v56, %v2224_v16 }
 0x10a   : > { %v591_v48 = vmul.f32 %v2029_v38, %v2226_v17  ;;  %979 = vmatmul.mubr.bf16.gmra.mrb[8].mxu0 %v2759_v30  ;;  %1923 = vmatprep.subr.msk.bf16.mxu1 %vm296_vm0, %v673_v24  ;;  %v590_v37 = vmul.f32 %v2029_v38, %v2224_v16 }
 0x10b   : > { %1913 = vmatprep.mubr.msk.bf16.mxu0 %vm296_vm0, %v2795_v36  ;;  %1489 = vmatpush1.bf16.xpose.msra.mxu1 %v672_v54  ;;  %v625_v49 = vadd.f32 %v593_v13, %v420_v5  ;;  %v624_v7 = vadd.f32 %v592_v6, %v419_v51 }
 0x10c   : > { %v2031_v18 = vpop.eup %2030  ;;  %v623_v61 = vadd.f32 %v591_v48, %v418_v43  ;;  %v622_v32 = vadd.f32 %v590_v37, %v417_v62 }
 0x10d   : > { %v2033_v20 = vpop.eup %2032  ;;  %v657_v4 = vmul.f32 %v625_v49, %v3581_v23  ;;  %v656_v30 = vmul.f32 %v624_v7, %v3582_v3  ;;  %v424_v45 = vmul.f32 %v2031_v18, %v2222_v15  ;;  %v423_v57 = vmul.f32 %v2031_v18, %v2220_v14 }
 0x10e   : > { %v655_v21 = vmul.f32 %v623_v61, %v3583_v25  ;;  %v654_v34 = vmul.f32 %v622_v32, %v3584_v31  ;;  %v422_v35 = vmul.f32 %v2033_v20, %v2222_v15  ;;  %v421_v40 = vmul.f32 %v2033_v20, %v2220_v14 }
 0x110   : > { %v2035_v22 = vpop.eup %2034  ;;  %v675_v11 = vpack.c.bf16 %v657_v4, %v655_v21  ;;  %v674_v36 = vpack.c.bf16 %v656_v30, %v654_v34 }
 0x111   : > { %v2037_v27 = vpop.eup %2036  ;;  %v597_v63 = vmul.f32 %v2035_v22, %v2226_v17  ;;  %v596_v42 = vmul.f32 %v2035_v22, %v2224_v16 }
 0x112   : > { %v595_v58 = vmul.f32 %v2037_v27, %v2226_v17  ;;  %987 = vmatmul.mubr.bf16.gmra.mrb[12].mxu0 %v2797_v2  ;;  %1924 = vmatprep.subr.msk.bf16.mxu1 %vm296_vm0, %v675_v11  ;;  %v594_v53 = vmul.f32 %v2037_v27, %v2224_v16 }
 0x113   : > { %1914 = vmatprep.mubr.msk.bf16.mxu0 %vm296_vm0, %v2817_v8  ;;  %1491 = vmatpush1.bf16.xpose.msra.mxu1 %v674_v36  ;;  %v629_v15 = vadd.f32 %v597_v63, %v424_v45  ;;  %v628_v44 = vadd.f32 %v596_v42, %v423_v57 }
 0x114   : > { %v627_v9 = vadd.f32 %v595_v58, %v422_v35  ;;  %v626_v41 = vadd.f32 %v594_v53, %v421_v40 }
 0x115   : > { %v661_v59 = vmul.f32 %v629_v15, %v3585_v55  ;;  %v660_v17 = vmul.f32 %v628_v44, %v3586_v29 }
 0x116   : > { %v659_v2 = vmul.f32 %v627_v9, %v3587_v39  ;;  %v658_v33 = vmul.f32 %v626_v41, %v3588_v60 }
 0x118   : > { %v677_v47 = vpack.c.bf16 %v661_v59, %v659_v2  ;;  %v676_v14 = vpack.c.bf16 %v660_v17, %v658_v33 }
 0x11a   : > { %995 = vmatmul.mubr.bf16.gmra.mrb[16].mxu0 %v2819_v26  ;;  %1925 = vmatprep.subr.msk.bf16.mxu1 %vm296_vm0, %v677_v47 }
 0x11b   : > { %1915 = vmatprep.mubr.msk.bf16.mxu0 %vm296_vm0, %v673_v24  ;;  %1493 = vmatpush1.bf16.xpose.msra.mxu1 %v676_v14 }
 0x122   : > { %1003 = vmatmul.mubr.bf16.gmra.mrb[20].mxu0 %v672_v54  ;;  %1511 = vmatmul.mubr.bf16.vlgmr.msra.gmra.mrb[0].mxu1 %v2683_v0 }
 0x123   : > { %1916 = vmatprep.mubr.msk.bf16.mxu0 %vm296_vm0, %v675_v11  ;;  %1927 = vmatprep.mubr.msk.bf16.mxu1 %vm296_vm0, %v2700_v1 }
 0x12a   : > { %1011 = vmatmul.mubr.bf16.gmra.mrb[24].mxu0 %v674_v36  ;;  %1519 = vmatmul.mubr.bf16.gmra.mrb[4].mxu1 %v2702_v10 }
 0x12b   : > { %1917 = vmatprep.mubr.msk.bf16.mxu0 %vm296_vm0, %v677_v47  ;;  %1928 = vmatprep.mubr.msk.bf16.mxu1 %vm296_vm0, %v2738_v28 }
 0x132   : > { %1019 = vmatmul.mubr.bf16.gmra.mrb[28].mxu0 %v676_v14  ;;  %1527 = vmatmul.mubr.bf16.gmra.mrb[8].mxu1 %v2740_v46 }
 0x133   : > { %1929 = vmatprep.mubr.msk.bf16.mxu1 %vm296_vm0, %v2776_v50 }
 0x13a   : > { %1535 = vmatmul.mubr.bf16.gmra.mrb[12].mxu1 %v2778_v19 }
 0x1cd   : > { %v964_v16 = vpop.f32.mrb[0].mxu0 }
 0x1ce   : > { %v2885_v0 = vmul.f32 0.5, %v964_v16  ;;  %v966_v1 = vpop.f32.mrb[1].mxu0 }
 0x1cf   : > { %v967_v8 = vpop.f32.mrb[2].mxu0 }
 0x1d0   : > { %v1065_v10 = vmul.f32 %v2885_v0, %v2885_v0  ;;  %v2889_v26 = vmul.f32 0.5, %v967_v8  ;;  %v969_v52 = vpop.f32.mrb[3].mxu0  ;;  %v1043_v28 = vsel %vm296_vm0, %v2885_v0, 0.0 }
 0x1d2   : > { %v1044_v46 = vsel %vm296_vm0, %v2889_v26, 0.0  ;;  %v1066_v50 = vmul.f32 %v2889_v26, %v2889_v26  ;;  %v1073_v12 = vsel %vm296_vm0, %v1065_v10, 0.0 }
 0x1d3   : > { %v1045_v19 = vadd.f32 %v1044_v46, %v1043_v28 }
 0x1d4   : > { %v1074_v56 = vsel %vm296_vm0, %v1066_v50, 0.0 }
 0x1d5   : > { %v1075_v5 = vadd.f32 %v1074_v56, %v1073_v12  ;;  %v972_v24 = vpop.f32.mrb[4].mxu0 }
 0x1d6   : > { %v2899_v54 = vmul.f32 0.5, %v972_v24  ;;  %v974_v38 = vpop.f32.mrb[5].mxu0 }
 0x1d7   : > { %v975_v43 = vpop.f32.mrb[6].mxu0 }
 0x1d8   : > { %v1046_v13 = vsel %vm296_vm0, %v2899_v54, 0.0  ;;  %v1067_v51 = vmul.f32 %v2899_v54, %v2899_v54  ;;  %v2905_v6 = vmul.f32 0.5, %v975_v43  ;;  %v977_v48 = vpop.f32.mrb[7].mxu0 }
 0x1d9   : > { %v1047_v62 = vadd.f32 %v1046_v13, %v1045_v19 }
 0x1da   : > { %v1076_v37 = vsel %vm296_vm0, %v1067_v51, 0.0  ;;  %v1048_v49 = vsel %vm296_vm0, %v2905_v6, 0.0  ;;  %v1068_v7 = vmul.f32 %v2905_v6, %v2905_v6 }
 0x1db   : > { %v1077_v18 = vadd.f32 %v1076_v37, %v1075_v5  ;;  %v1049_v61 = vadd.f32 %v1048_v49, %v1047_v62 }
 0x1dc   : > { %v1078_v32 = vsel %vm296_vm0, %v1068_v7, 0.0 }
 0x1dd   : > { %v1079_v20 = vadd.f32 %v1078_v32, %v1077_v18  ;;  %v980_v23 = vpop.f32.mrb[8].mxu0 }
 0x1de   : > { %v2913_v4 = vmul.f32 0.5, %v980_v23  ;;  %v982_v3 = vpop.f32.mrb[9].mxu0 }
 0x1df   : > { %v983_v30 = vpop.f32.mrb[10].mxu0 }
 0x1e0   : > { %v1050_v25 = vsel %vm296_vm0, %v2913_v4, 0.0  ;;  %v1069_v21 = vmul.f32 %v2913_v4, %v2913_v4  ;;  %v2919_v31 = vmul.f32 0.5, %v983_v30  ;;  %v985_v34 = vpop.f32.mrb[11].mxu0 }
 0x1e1   : > { %v1051_v22 = vadd.f32 %v1050_v25, %v1049_v61 }
 0x1e2   : > { %v1080_v45 = vsel %vm296_vm0, %v1069_v21, 0.0  ;;  %v1052_v11 = vsel %vm296_vm0, %v2919_v31, 0.0  ;;  %v1070_v36 = vmul.f32 %v2919_v31, %v2919_v31 }
 0x1e3   : > { %v1081_v27 = vadd.f32 %v1080_v45, %v1079_v20  ;;  %v1053_v35 = vadd.f32 %v1052_v11, %v1051_v22 }
 0x1e4   : > { %v1082_v63 = vsel %vm296_vm0, %v1070_v36, 0.0 }
 0x1e5   : > { %v1083_v57 = vadd.f32 %v1082_v63, %v1081_v27  ;;  %v988_v42 = vpop.f32.mrb[12].mxu0 }
 0x1e6   : > { %v2927_v58 = vmul.f32 0.5, %v988_v42  ;;  %v990_v40 = vpop.f32.mrb[13].mxu0 }
 0x1e7   : > { %v991_v53 = vpop.f32.mrb[14].mxu0 }
 0x1e8   : > { %v1054_v15 = vsel %vm296_vm0, %v2927_v58, 0.0  ;;  %v1071_v44 = vmul.f32 %v2927_v58, %v2927_v58  ;;  %v2933_v9 = vmul.f32 0.5, %v991_v53  ;;  %v993_v41 = vpop.f32.mrb[15].mxu0 }
 0x1e9   : > { %v1055_v55 = vadd.f32 %v1054_v15, %v1053_v35 }
 0x1ea   : > { %v1084_v59 = vsel %vm296_vm0, %v1071_v44, 0.0  ;;  %v1056_v29 = vsel %vm296_vm0, %v2933_v9, 0.0  ;;  %v1072_v17 = vmul.f32 %v2933_v9, %v2933_v9 }
 0x1eb   : > { %v1085_v39 = vadd.f32 %v1084_v59, %v1083_v57  ;;  %v1057_v2 = vadd.f32 %v1056_v29, %v1055_v55 }
 0x1ec   : > { %v1086_v60 = vsel %vm296_vm0, %v1072_v17, 0.0 }
 0x1ed   : > { %v1058_v33 = vrot.slane %v1057_v2, 4  ;;  %v1087_v47 = vadd.f32 %v1086_v60, %v1085_v39  ;;  %v996_v14 = vpop.f32.mrb[16].mxu0 }
 0x1ee   : > { %v2941_v16 = vmul.f32 0.5, %v996_v14  ;;  %v998_v1 = vpop.f32.mrb[17].mxu0 }
 0x1ef   : > { %v1059_v8 = vadd.f32 %v1058_v33, %v1057_v2  ;;  %v1088_v10 = vrot.slane %v1087_v47, 4  ;;  %v999_v52 = vpop.f32.mrb[18].mxu0 }
 0x1f0   : > { %v1283_v28 = vmul.f32 %v2941_v16, %v2941_v16  ;;  %v2945_v46 = vmul.f32 0.5, %v999_v52  ;;  %v1001_v50 = vpop.f32.mrb[19].mxu0  ;;  %v1261_v56 = vsel %vm296_vm0, %v2941_v16, 0.0 }
 0x1f1   : > { %v1060_v19 = vrot.slane %v1059_v8, 2  ;;  %v1089_v12 = vadd.f32 %v1088_v10, %v1087_v47 }
 0x1f2   : > { %v1262_v5 = vsel %vm296_vm0, %v2945_v46, 0.0  ;;  %v1284_v24 = vmul.f32 %v2945_v46, %v2945_v46  ;;  %v1291_v51 = vsel %vm296_vm0, %v1283_v28, 0.0 }
 0x1f3   : > { %v1061_v38 = vadd.f32 %v1060_v19, %v1059_v8  ;;  %v1090_v43 = vrot.slane %v1089_v12, 2  ;;  %v1263_v13 = vadd.f32 %v1262_v5, %v1261_v56 }
 0x1f4   : > { %v1292_v48 = vsel %vm296_vm0, %v1284_v24, 0.0 }
 0x1f5   : > { %v1062_v62 = vrot.slane %v1061_v38, 1  ;;  %v1091_v37 = vadd.f32 %v1090_v43, %v1089_v12  ;;  %v1293_v49 = vadd.f32 %v1292_v48, %v1291_v51  ;;  %v1004_v7 = vpop.f32.mrb[20].mxu0  ;;  %v1512_v18 = vpop.f32.mrb[0].mxu1 }
 0x1f6   : > { %v2955_v61 = vmul.f32 0.5, %v1004_v7  ;;  %v1006_v32 = vpop.f32.mrb[21].mxu0  ;;  %v1514_v20 = vpop.f32.mrb[1].mxu1  ;;  %v2961_v34 = vmul.f32 0.5, %v1512_v18 }
 0x1f7   : > { %v1063_v23 = vadd.f32 %v1062_v62, %v1061_v38  ;;  %v1007_v3 = vpop.f32.mrb[22].mxu0  ;;  %v1515_v30 = vpop.f32.mrb[2].mxu1  ;;  %v1092_v27 = vrot.slane %v1091_v37, 1 }
 0x1f8   : > { %v1264_v25 = vsel %vm296_vm0, %v2955_v61, 0.0  ;;  %v1285_v21 = vmul.f32 %v2955_v61, %v2955_v61  ;;  %v2963_v22 = vmul.f32 0.5, %v1007_v3  ;;  %v1009_v45 = vpop.f32.mrb[23].mxu0  ;;  %v1517_v11 = vpop.f32.mrb[3].mxu1  ;;  %v2965_v63 = vmul.f32 0.5, %v1515_v30 }
 0x1f9   : > { %v1064_v36 = vmul.f32 0.015625, %v1063_v23  ;;  %v1265_v35 = vadd.f32 %v1264_v25, %v1263_v13  ;;  %v1565_v55 = vmul.f32 %v2961_v34, %v2961_v34  ;;  %v1093_v17 = vadd.f32 %v1092_v27, %v1091_v37 }
 0x1fa   : > { %v1294_v57 = vsel %vm296_vm0, %v1285_v21, 0.0  ;;  %v1266_v42 = vsel %vm296_vm0, %v2963_v22, 0.0  ;;  %v1286_v40 = vmul.f32 %v2963_v22, %v2963_v22  ;;  %v1551_v41 = vadd.f32 %v2965_v63, %v2961_v34 }
 0x1fb   : > { %v1094_v53 = vmul.f32 64.0, %v1064_v36  ;;  %v1295_v15 = vadd.f32 %v1294_v57, %v1293_v49  ;;  %v1267_v44 = vadd.f32 %v1266_v42, %v1265_v35  ;;  %v1566_v29 = vmul.f32 %v2965_v63, %v2965_v63 }
 0x1fc   : > { %v1296_v59 = vsel %vm296_vm0, %v1286_v40, 0.0 }
 0x1fd   : > { %v1095_v39 = vmul.f32 %v1094_v53, %v1064_v36  ;;  %v1297_v2 = vadd.f32 %v1296_v59, %v1295_v15  ;;  %v1012_v60 = vpop.f32.mrb[24].mxu0  ;;  %v1520_v33 = vpop.f32.mrb[4].mxu1  ;;  %v1573_v47 = vadd.f32 %v1566_v29, %v1565_v55 }
 0x1fe   : > { %v2979_v14 = vmul.f32 0.5, %v1012_v60  ;;  %v2981_v1 = vmul.f32 0.5, %v1520_v33  ;;  %v1014_v8 = vpop.f32.mrb[25].mxu0  ;;  %v1522_v10 = vpop.f32.mrb[5].mxu1 }
 0x1ff   : > { %v1096_v52 = vsub.f32 %v1093_v17, %v1095_v39  ;;  %v1015_v28 = vpop.f32.mrb[26].mxu0  ;;  %v1523_v50 = vpop.f32.mrb[6].mxu1 }
 0x200   : > { %v1268_v19 = vsel %vm296_vm0, %v2979_v14, 0.0  ;;  %v1287_v12 = vmul.f32 %v2979_v14, %v2979_v14  ;;  %v1552_v56 = vadd.f32 %v1551_v41, %v2981_v1  ;;  %v1567_v5 = vmul.f32 %v2981_v1, %v2981_v1  ;;  %v1017_v24 = vpop.f32.mrb[27].mxu0  ;;  %v1525_v38 = vpop.f32.mrb[7].mxu1 }
 0x201   : > { %v1098_v43 = vmul.f32 0.015873017, %v1096_v52  ;;  %v1269_v13 = vadd.f32 %v1268_v19, %v1267_v44  ;;  %v2990_v51 = vmul.f32 0.5, %v1015_v28  ;;  %v2992_v48 = vmul.f32 0.5, %v1523_v50 }
 0x202   : > { %v1298_v62 = vsel %vm296_vm0, %v1287_v12, 0.0  ;;  %v1574_v37 = vadd.f32 %v1573_v47, %v1567_v5 }
 0x203   : > { %v1099_v49 = vadd.f32 1e-05, %v1098_v43  ;;  %v1299_v7 = vadd.f32 %v1298_v62, %v1297_v2  ;;  %v1270_v18 = vsel %vm296_vm0, %v2990_v51, 0.0  ;;  %v1288_v32 = vmul.f32 %v2990_v51, %v2990_v51 }
 0x204   : > { %v1271_v20 = vadd.f32 %v1270_v18, %v1269_v13  ;;  %v1553_v23 = vadd.f32 %v1552_v56, %v2992_v48  ;;  %v1568_v3 = vmul.f32 %v2992_v48, %v2992_v48 }
 0x205   : > { %2038 = vrsqrt.f32 %v1099_v49  ;;  %v1300_v30 = vsel %vm296_vm0, %v1288_v32, 0.0  ;;  %v1020_v25 = vpop.f32.mrb[28].mxu0  ;;  %v1528_v21 = vpop.f32.mrb[8].mxu1 }
 0x206   : > { %v1301_v45 = vadd.f32 %v1300_v30, %v1299_v7  ;;  %v1575_v11 = vadd.f32 %v1574_v37, %v1568_v3  ;;  %v3003_v36 = vmul.f32 0.5, %v1020_v25  ;;  %v3005_v27 = vmul.f32 0.5, %v1528_v21  ;;  %v1022_v35 = vpop.f32.mrb[29].mxu0  ;;  %v1530_v57 = vpop.f32.mrb[9].mxu1 }
 0x207   : > { %v1023_v42 = vpop.f32.mrb[30].mxu0  ;;  %v1531_v40 = vpop.f32.mrb[10].mxu1 }
 0x208   : > { %v1272_v53 = vsel %vm296_vm0, %v3003_v36, 0.0  ;;  %v1289_v15 = vmul.f32 %v3003_v36, %v3003_v36  ;;  %v1554_v44 = vadd.f32 %v1553_v23, %v3005_v27  ;;  %v1569_v41 = vmul.f32 %v3005_v27, %v3005_v27  ;;  %v1025_v55 = vpop.f32.mrb[31].mxu0  ;;  %v1533_v59 = vpop.f32.mrb[11].mxu1 }
 0x209   : > { %v1273_v29 = vadd.f32 %v1272_v53, %v1271_v20  ;;  %v3014_v17 = vmul.f32 0.5, %v1023_v42  ;;  %v3016_v39 = vmul.f32 0.5, %v1531_v40 }
 0x20a   : > { %v1302_v2 = vsel %vm296_vm0, %v1289_v15, 0.0  ;;  %v1576_v60 = vadd.f32 %v1575_v11, %v1569_v41 }
 0x20b   : > { %v1303_v33 = vadd.f32 %v1302_v2, %v1301_v45  ;;  %v1274_v47 = vsel %vm296_vm0, %v3014_v17, 0.0  ;;  %v1290_v8 = vmul.f32 %v3014_v17, %v3014_v17  ;;  %v1555_v10 = vadd.f32 %v1554_v44, %v3016_v39 }
 0x20c   : > { %v1275_v52 = vadd.f32 %v1274_v47, %v1273_v29  ;;  %v1570_v28 = vmul.f32 %v3016_v39, %v3016_v39 }
 0x20d   : > { %v1304_v50 = vsel %vm296_vm0, %v1290_v8, 0.0  ;;  %v1536_v19 = vpop.f32.mrb[12].mxu1 }
 0x20e   : > { %v1276_v12 = vrot.slane %v1275_v52, 4  ;;  %v1305_v56 = vadd.f32 %v1304_v50, %v1303_v33  ;;  %v1577_v5 = vadd.f32 %v1576_v60, %v1570_v28  ;;  %v3027_v24 = vmul.f32 0.5, %v1536_v19  ;;  %v1538_v38 = vpop.f32.mrb[13].mxu1 }
 0x20f   : > { %v2039_v43 = vpop.eup %2038  ;;  %v1539_v13 = vpop.f32.mrb[14].mxu1 }
 0x210   : > { %v1101_v62 = vmul.f32 0.2, %v2039_v43  ;;  %v1556_v37 = vadd.f32 %v1555_v10, %v3027_v24  ;;  %v1541_v49 = vpop.f32.mrb[15].mxu1  ;;  %v1277_v7 = vadd.f32 %v1276_v12, %v1275_v52  ;;  %v1306_v18 = vrot.slane %v1305_v56, 4 }
 0x211   : > { %v1571_v32 = vmul.f32 %v3027_v24, %v3027_v24  ;;  %v3032_v20 = vmul.f32 0.5, %v1539_v13 }
 0x212   : > { %v3035_v23 = vmul.f32 %v1101_v62, %v2885_v0  ;;  %v3038_v3 = vmul.f32 %v1101_v62, %v2889_v26  ;;  %v3041_v30 = vmul.f32 %v1101_v62, %v2899_v54  ;;  %v3044_v25 = vmul.f32 %v1101_v62, %v2905_v6 }
 0x213   : > { %v3047_v21 = vmul.f32 %v1101_v62, %v2913_v4  ;;  %v3050_v45 = vmul.f32 %v1101_v62, %v2919_v31  ;;  %v3053_v11 = vmul.f32 %v1101_v62, %v2927_v58  ;;  %v3056_v0 = vmul.f32 %v1101_v62, %v2933_v9 }
 0x214   : > { %v1110_v26 = vsel %vm296_vm0, %v3035_v23, -inf  ;;  %v1111_v54 = vsel %vm296_vm0, %v3038_v3, -inf  ;;  %v1112_v6 = vsel %vm296_vm0, %v3041_v30, -inf  ;;  %v1113_v4 = vsel %vm296_vm0, %v3044_v25, -inf }
 0x215   : > { %v1114_v31 = vsel %vm296_vm0, %v3047_v21, -inf  ;;  %v1116_v58 = vsel %vm296_vm0, %v3050_v45, -inf  ;;  %v1118_v9 = vsel %vm296_vm0, %v3053_v11, -inf  ;;  %v1120_v35 = vsel %vm296_vm0, %v3056_v0, -inf }
 0x216   : > { %v1115_v57 = vmax.f32 %v1110_v26, %v1114_v31  ;;  %v1117_v42 = vmax.f32 %v1111_v54, %v1116_v58  ;;  %v1119_v40 = vmax.f32 %v1112_v6, %v1118_v9  ;;  %v1121_v53 = vmax.f32 %v1113_v4, %v1120_v35 }
 0x217   : > { %v1278_v15 = vrot.slane %v1277_v7, 2  ;;  %v1307_v44 = vadd.f32 %v1306_v18, %v1305_v56  ;;  %v1578_v41 = vadd.f32 %v1577_v5, %v1571_v32  ;;  %v1557_v55 = vadd.f32 %v1556_v37, %v3032_v20 }
 0x218   : > { %v1122_v59 = vmax.f32 %v1115_v57, %v1117_v42  ;;  %v1123_v29 = vmax.f32 %v1119_v40, %v1121_v53  ;;  %v1572_v2 = vmul.f32 %v3032_v20, %v3032_v20 }
 0x219   : > { %v1279_v60 = vadd.f32 %v1278_v15, %v1277_v7  ;;  %v1308_v33 = vrot.slane %v1307_v44, 2  ;;  %v1558_v47 = vrot.slane %v1557_v55, 4 }
 0x21a   : > { %v1124_v8 = vmax.f32 %v1122_v59, %v1123_v29  ;;  %v1579_v10 = vadd.f32 %v1578_v41, %v1572_v2 }
 0x21b   : > { %v1280_v52 = vrot.slane %v1279_v60, 1  ;;  %v1309_v28 = vadd.f32 %v1308_v33, %v1307_v44  ;;  %v1559_v50 = vadd.f32 %v1558_v47, %v1557_v55 }
 0x21c   : > { %v1125_v19 = vrot.slane %v1124_v8, 4  ;;  %v1580_v12 = vrot.slane %v1579_v10, 4 }
 0x21d   : > { %v1281_v38 = vadd.f32 %v1280_v52, %v1279_v60  ;;  %v1560_v56 = vrot.slane %v1559_v50, 2  ;;  %v1310_v62 = vrot.slane %v1309_v28, 1 }
 0x21e   : > { %v1126_v5 = vmax.f32 %v1124_v8, %v1125_v19  ;;  %v1581_v43 = vadd.f32 %v1580_v12, %v1579_v10 }
 0x21f   : > { %v1282_v13 = vmul.f32 0.015625, %v1281_v38  ;;  %v1561_v37 = vadd.f32 %v1560_v56, %v1559_v50  ;;  %v1311_v6 = vadd.f32 %v1310_v62, %v1309_v28 }
 0x220   : > { %v1127_v49 = vrot.slane %v1126_v5, 2  ;;  %v1582_v18 = vrot.slane %v1581_v43, 2 }
 0x221   : > { %v1312_v32 = vmul.f32 64.0, %v1282_v13  ;;  %v1562_v7 = vrot.slane %v1561_v37, 1 }
 0x222   : > { %v1128_v26 = vmax.f32 %v1126_v5, %v1127_v49  ;;  %v1583_v54 = vadd.f32 %v1582_v18, %v1581_v43 }
 0x223   : > { %v1313_v4 = vmul.f32 %v1312_v32, %v1282_v13  ;;  %v1563_v31 = vadd.f32 %v1562_v7, %v1561_v37 }
 0x224   : > { %v1129_v58 = vrot.slane %v1128_v26, 1  ;;  %v1584_v42 = vrot.slane %v1583_v54, 1 }
 0x225   : > { %v1314_v9 = vsub.f32 %v1311_v6, %v1313_v4  ;;  %v1564_v35 = vmul.f32 0.015625, %v1563_v31 }
 0x226   : > { %v1130_v57 = vmax.f32 %v1128_v26, %v1129_v58  ;;  %v1585_v33 = vadd.f32 %v1584_v42, %v1583_v54 }
 0x227   : > { %v1315_v40 = vmul.f32 0.015873017, %v1314_v9  ;;  %v1586_v53 = vmul.f32 64.0, %v1564_v35 }
 0x228   : > { %v1131_v15 = vsub.f32 %v3035_v23, %v1130_v57  ;;  %v1133_v44 = vsub.f32 %v3041_v30, %v1130_v57  ;;  %v1134_v41 = vsub.f32 %v3044_v25, %v1130_v57  ;;  %v1135_v55 = vsub.f32 %v3047_v21, %v1130_v57 }
 0x229   : > { %v1136_v59 = vsub.f32 %v3050_v45, %v1130_v57  ;;  %v1137_v29 = vsub.f32 %v3053_v11, %v1130_v57  ;;  %v1138_v2 = vsub.f32 %v3056_v0, %v1130_v57  ;;  %v1316_v60 = vadd.f32 1e-05, %v1315_v40 }
 0x22a   : > { %v1587_v47 = vmul.f32 %v1586_v53, %v1564_v35  ;;  %v1132_v10 = vsub.f32 %v3038_v3, %v1130_v57  ;;  %v1139_v23 = vmul.f32 1.442695, %v1131_v15  ;;  %v1143_v25 = vmul.f32 1.442695, %v1133_v44 }
 0x22b   : > { %2040 = vrsqrt.f32 %v1316_v60  ;;  %v1145_v21 = vmul.f32 1.442695, %v1134_v41  ;;  %v1147_v11 = vmul.f32 1.442695, %v1135_v55  ;;  %v1149_v50 = vmul.f32 1.442695, %v1136_v59 }
 0x22c   : > { %v1588_v8 = vsub.f32 %v1585_v33, %v1587_v47  ;;  %v1141_v28 = vmul.f32 1.442695, %v1132_v10  ;;  %2042 = vpow2.f32 %v1139_v23  ;;  %v1151_v19 = vmul.f32 1.442695, %v1137_v29 }
 0x22e   : > { %v1589_v52 = vmul.f32 0.015873017, %v1588_v8 }
 0x230   : > { %v1590_v30 = vadd.f32 1e-05, %v1589_v52 }
 0x232   : > { %2044 = vrsqrt.f32 %v1590_v30 }
 0x233   : > { %2046 = vpow2.f32 %v1141_v28 }
 0x234   : > { %2048 = vpow2.f32 %v1143_v25 }
 0x235   : > { %v2041_v45 = vpop.eup %2040  ;;  %2050 = vpow2.f32 %v1145_v21 }
 0x236   : > { %v1318_v0 = vmul.f32 0.2, %v2041_v45  ;;  %2052 = vpow2.f32 %v1147_v11  ;;  %v3121_v62 = vpop.eup %2042 }
 0x237   : > { %2054 = vpow2.f32 %v1149_v50  ;;  %v1155_v58 = vsel %vm296_vm0, %v3121_v62, 0.0 }
 0x238   : > { %v3086_v12 = vmul.f32 %v1318_v0, %v2941_v16  ;;  %v3089_v3 = vmul.f32 %v1318_v0, %v2945_v46  ;;  %v3092_v38 = vmul.f32 %v1318_v0, %v2955_v61  ;;  %v3095_v56 = vmul.f32 %v1318_v0, %v2963_v22 }
 0x239   : > { %v3098_v5 = vmul.f32 %v1318_v0, %v2979_v14  ;;  %v3101_v43 = vmul.f32 %v1318_v0, %v2990_v51  ;;  %v3104_v13 = vmul.f32 %v1318_v0, %v3003_v36  ;;  %v3107_v16 = vmul.f32 %v1318_v0, %v3014_v17 }
 0x23a   : > { %v1327_v46 = vsel %vm296_vm0, %v3086_v12, -inf  ;;  %v1328_v61 = vsel %vm296_vm0, %v3089_v3, -inf  ;;  %v1329_v22 = vsel %vm296_vm0, %v3092_v38, -inf  ;;  %v1153_v14 = vmul.f32 1.442695, %v1138_v2 }
 0x23b   : > { %v1330_v51 = vsel %vm296_vm0, %v3095_v56, -inf  ;;  %v1331_v36 = vsel %vm296_vm0, %v3098_v5, -inf  ;;  %v1333_v17 = vsel %vm296_vm0, %v3101_v43, -inf  ;;  %v1335_v18 = vsel %vm296_vm0, %v3104_v13, -inf }
 0x23c   : > { %v1332_v37 = vmax.f32 %v1327_v46, %v1331_v36  ;;  %v1334_v49 = vmax.f32 %v1328_v61, %v1333_v17  ;;  %v2045_v32 = vpop.eup %2044  ;;  %v1336_v7 = vmax.f32 %v1329_v22, %v1335_v18  ;;  %v1337_v26 = vsel %vm296_vm0, %v3107_v16, -inf }
 0x23d   : > { %v3127_v54 = vpop.eup %2046  ;;  %2056 = vpow2.f32 %v1151_v19  ;;  %v1338_v6 = vmax.f32 %v1330_v51, %v1337_v26  ;;  %v1592_v31 = vmul.f32 0.2, %v2045_v32 }
 0x23e   : > { %v1339_v4 = vmax.f32 %v1332_v37, %v1334_v49  ;;  %2058 = vpow2.f32 %v1153_v14  ;;  %v1156_v9 = vsel %vm296_vm0, %v3127_v54, 0.0  ;;  %v3133_v35 = vpop.eup %2048 }
 0x23f   : > { %v1340_v57 = vmax.f32 %v1336_v7, %v1338_v6  ;;  %v3136_v42 = vmul.f32 %v1592_v31, %v2961_v34  ;;  %v3139_v40 = vmul.f32 %v1592_v31, %v2965_v63  ;;  %v3142_v53 = vmul.f32 %v1592_v31, %v2981_v1  ;;  %v3144_v15 = vpop.eup %2050 }
 0x240   : > { %v3147_v44 = vmul.f32 %v1592_v31, %v2992_v48  ;;  %v3150_v41 = vmul.f32 %v1592_v31, %v3005_v27  ;;  %v3153_v55 = vmul.f32 %v1592_v31, %v3016_v39  ;;  %v3156_v34 = vmul.f32 %v1592_v31, %v3027_v24  ;;  %v3161_v29 = vpop.eup %2052 }
 0x241   : > { %v1341_v59 = vmax.f32 %v1339_v4, %v1340_v57  ;;  %v3159_v63 = vmul.f32 %v1592_v31, %v3032_v20  ;;  %v1157_v1 = vadd.f32 %v1156_v9, %v1155_v58  ;;  %v1158_v24 = vsel %vm296_vm0, %v3133_v35, 0.0  ;;  %v3175_v8 = vpop.eup %2054 }
 0x242   : > { %v1601_v48 = vmax.f32 %v3136_v42, %v3150_v41  ;;  %v1602_v27 = vmax.f32 %v3139_v40, %v3153_v55  ;;  %v1603_v39 = vmax.f32 %v3142_v53, %v3156_v34  ;;  %v1160_v33 = vsel %vm296_vm0, %v3144_v15, 0.0 }
 0x243   : > { %v1342_v2 = vrot.slane %v1341_v59, 4  ;;  %v1604_v20 = vmax.f32 %v3147_v44, %v3159_v63  ;;  %v1159_v60 = vadd.f32 %v1158_v24, %v1157_v1  ;;  %v1162_v30 = vsel %vm296_vm0, %v3161_v29, 0.0 }
 0x244   : > { %v1605_v47 = vmax.f32 %v1601_v48, %v1602_v27  ;;  %v1164_v0 = vsel %vm296_vm0, %v3175_v8, 0.0 }
 0x245   : > { %v1343_v10 = vmax.f32 %v1341_v59, %v1342_v2  ;;  %v1606_v23 = vmax.f32 %v1603_v39, %v1604_v20  ;;  %v1161_v52 = vadd.f32 %v1160_v33, %v1159_v60 }
 0x247   : > { %v3179_v28 = vpop.eup %2056  ;;  %v1344_v25 = vrot.slane %v1343_v10, 2  ;;  %v1607_v21 = vmax.f32 %v1605_v47, %v1606_v23  ;;  %v1163_v45 = vadd.f32 %v1162_v30, %v1161_v52 }
 0x248   : > { %v3181_v11 = vpop.eup %2058  ;;  %v1166_v61 = vsel %vm296_vm0, %v3179_v28, 0.0 }
 0x249   : > { %v1345_v50 = vmax.f32 %v1343_v10, %v1344_v25  ;;  %v1608_v19 = vrot.slane %v1607_v21, 4  ;;  %v1165_v46 = vadd.f32 %v1164_v0, %v1163_v45  ;;  %v1168_v36 = vsel %vm296_vm0, %v3181_v11, 0.0 }
 0x24b   : > { %v1346_v22 = vrot.slane %v1345_v50, 1  ;;  %v1609_v14 = vmax.f32 %v1607_v21, %v1608_v19  ;;  %v1167_v51 = vadd.f32 %v1166_v61, %v1165_v46 }
 0x24d   : > { %v3189_v17 = vmax.f32 %v1345_v50, %v1346_v22  ;;  %v1610_v37 = vrot.slane %v1609_v14, 2  ;;  %v1169_v49 = vadd.f32 %v1168_v36, %v1167_v51 }
 0x24f   : > { %v1348_v18 = vsub.f32 %v3086_v12, %v3189_v17  ;;  %v1350_v32 = vsub.f32 %v3092_v38, %v3189_v17  ;;  %v1351_v7 = vsub.f32 %v3095_v56, %v3189_v17  ;;  %v1352_v26 = vsub.f32 %v3098_v5, %v3189_v17 }
 0x250   : > { %v1353_v6 = vsub.f32 %v3101_v43, %v3189_v17  ;;  %v1354_v4 = vsub.f32 %v3104_v13, %v3189_v17  ;;  %v1355_v31 = vsub.f32 %v3107_v16, %v3189_v17  ;;  %v1611_v58 = vmax.f32 %v1609_v14, %v1610_v37 }
 0x251   : > { %v1349_v12 = vsub.f32 %v3089_v3, %v3189_v17  ;;  %v1170_v9 = vrot.slane %v1169_v49, 4  ;;  %v1356_v27 = vmul.f32 1.442695, %v1348_v18  ;;  %v1360_v39 = vmul.f32 1.442695, %v1350_v32 }
 0x252   : > { %v1612_v38 = vrot.slane %v1611_v58, 1  ;;  %v1366_v33 = vmul.f32 1.442695, %v1353_v6  ;;  %v1368_v10 = vmul.f32 1.442695, %v1354_v4 }
 0x253   : > { %v1171_v43 = vadd.f32 %v1170_v9, %v1169_v49  ;;  %2060 = vpow2.f32 %v1356_v27  ;;  %v1358_v60 = vmul.f32 1.442695, %v1349_v12  ;;  %v1370_v19 = vmul.f32 1.442695, %v1355_v31 }
 0x254   : > { %v1613_v57 = vmax.f32 %v1611_v58, %v1612_v38  ;;  %2062 = vpow2.f32 %v1360_v39 }
 0x255   : > { %v1172_v24 = vrot.slane %v1171_v43, 2 }
 0x256   : > { %v1614_v56 = vsub.f32 %v3136_v42, %v1613_v57  ;;  %v1616_v5 = vsub.f32 %v3142_v53, %v1613_v57  ;;  %v1617_v59 = vsub.f32 %v3147_v44, %v1613_v57  ;;  %v1618_v1 = vsub.f32 %v3150_v41, %v1613_v57 }
 0x257   : > { %v1619_v13 = vsub.f32 %v3153_v55, %v1613_v57  ;;  %v1620_v16 = vsub.f32 %v3156_v34, %v1613_v57  ;;  %v1621_v48 = vsub.f32 %v3159_v63, %v1613_v57  ;;  %v1615_v3 = vsub.f32 %v3139_v40, %v1613_v57 }
 0x258   : > { %v1622_v2 = vmul.f32 1.442695, %v1614_v56  ;;  %v1362_v42 = vmul.f32 1.442695, %v1351_v7  ;;  %v1173_v20 = vadd.f32 %v1172_v24, %v1171_v43  ;;  %v1626_v41 = vmul.f32 1.442695, %v1616_v5 }
 0x259   : > { %v1624_v53 = vmul.f32 1.442695, %v1615_v3  ;;  %v1628_v34 = vmul.f32 1.442695, %v1617_v59  ;;  %v1364_v63 = vmul.f32 1.442695, %v1352_v26 }
 0x25a   : > { %v1174_v44 = vrot.slane %v1173_v20, 1  ;;  %2064 = vpow2.f32 %v1622_v2  ;;  %v1630_v40 = vmul.f32 1.442695, %v1618_v1  ;;  %v1632_v47 = vmul.f32 1.442695, %v1619_v13 }
 0x25b   : > { %2066 = vpow2.f32 %v1362_v42  ;;  %v1634_v52 = vmul.f32 1.442695, %v1620_v16  ;;  %v1636_v25 = vmul.f32 1.442695, %v1621_v48 }
 0x25c   : > { %v1175_v55 = vadd.f32 %v1174_v44, %v1173_v20  ;;  %2068 = vpow2.f32 %v1624_v53 }
 0x25d   : > { %v3215_v23 = vpop.eup %2060 }
 0x25e   : > { %2070 = vrcp.f32 %v1175_v55  ;;  %v3217_v30 = vpop.eup %2062 }
 0x25f   : > { %2072 = vpow2.f32 %v1626_v41  ;;  %v1375_v9 = vsel %vm296_vm0, %v3217_v30, 0.0 }
 0x260   : > { %2074 = vpow2.f32 %v1358_v60 }
 0x261   : > { %2076 = vpow2.f32 %v1628_v34 }
 0x262   : > { %2078 = vpow2.f32 %v1364_v63 }
 0x263   : > { %2080 = vpow2.f32 %v1630_v40 }
 0x264   : > { %2082 = vpow2.f32 %v1366_v33  ;;  %v3219_v21 = vpop.eup %2064 }
 0x265   : > { %2084 = vpow2.f32 %v1632_v47  ;;  %v3221_v45 = vpop.eup %2066 }
 0x266   : > { %2086 = vpow2.f32 %v1368_v10  ;;  %v3223_v0 = vpop.eup %2068  ;;  %v1377_v59 = vsel %vm296_vm0, %v3221_v45, 0.0 }
 0x267   : > { %2088 = vpow2.f32 %v1634_v52  ;;  %v1638_v46 = vadd.f32 %v3223_v0, %v3219_v21 }
 0x268   : > { %v2071_v50 = vpop.eup %2070  ;;  %2090 = vpow2.f32 %v1636_v25 }
 0x269   : > { %v3227_v61 = vpop.eup %2072  ;;  %v1178_v22 = vmul.f32 %v2071_v50, %v3127_v54  ;;  %v1177_v14 = vmul.f32 %v2071_v50, %v3121_v62  ;;  %v1180_v51 = vmul.f32 %v2071_v50, %v3144_v15  ;;  %v1179_v36 = vmul.f32 %v2071_v50, %v3133_v35 }
 0x26a   : > { %v3233_v17 = vpop.eup %2074  ;;  %v1181_v37 = vmul.f32 %v2071_v50, %v3161_v29  ;;  %v1182_v49 = vmul.f32 %v2071_v50, %v3175_v8  ;;  %v1183_v18 = vmul.f32 %v2071_v50, %v3179_v28  ;;  %v1639_v32 = vadd.f32 %v3227_v61, %v1638_v46 }
 0x26b   : > { %v3239_v7 = vpop.eup %2076  ;;  %v1188_v54 = vsel %vm296_vm0, %v1178_v22, 0.0  ;;  %v1185_v62 = vsel %vm296_vm0, %v1177_v14, 0.0  ;;  %v1372_v15 = vsel %vm296_vm0, %v3215_v23, 0.0  ;;  %2092 = vpow2.f32 %v1370_v19 }
 0x26c   : > { %v3245_v35 = vpop.eup %2078  ;;  %1189 = vadd.xlane.f32.xlu1 %v1188_v54  ;;  %1186 = vadd.xlane.f32.xlu0 %v1185_v62  ;;  %v1640_v29 = vadd.f32 %v3239_v7, %v1639_v32  ;;  %v1373_v28 = vsel %vm296_vm0, %v3233_v17, 0.0  ;;  %v3251_v26 = vmul.f32 %v2071_v50, %v3181_v11  ;;  %v1194_v12 = vsel %vm296_vm0, %v1180_v51, 0.0 }
 0x26d   : > { %v2081_v8 = vpop.eup %2080  ;;  %v1374_v31 = vadd.f32 %v1373_v28, %v1372_v15  ;;  %v1191_v38 = vsel %vm296_vm0, %v1179_v36, 0.0  ;;  %v1197_v16 = vsel %vm296_vm0, %v1181_v37, 0.0  ;;  %v1379_v48 = vsel %vm296_vm0, %v3245_v35, 0.0 }
 0x26e   : > { %v3253_v6 = vpop.eup %2082  ;;  %v1641_v4 = vadd.f32 %v2081_v8, %v1640_v29  ;;  %v1200_v53 = vsel %vm296_vm0, %v1182_v49, 0.0  ;;  %v1203_v63 = vsel %vm296_vm0, %v1183_v18, 0.0  ;;  %v3589_v22 = vlaneseq }
 0x26f   : > { %v2085_v58 = vpop.eup %2084  ;;  %v1376_v5 = vadd.f32 %v1375_v9, %v1374_v31  ;;  %v1381_v39 = vsel %vm296_vm0, %v3253_v6, 0.0 }
 0x270   : > { %v3259_v57 = vpop.eup %2086  ;;  %1195 = vadd.xlane.f32.xlu1 %v1194_v12  ;;  %1192 = vadd.xlane.f32.xlu0 %v1191_v38  ;;  %v1642_v56 = vadd.f32 %v2085_v58, %v1641_v4  ;;  %v3274_v14 = vand.u32 127, %v3589_v22  ;;  %v2102_v22 = vld [vmem:[%s3549_s1 + $0x28] sm:$0xff] }
 0x271   : > { %v2089_v11 = vpop.eup %2088  ;;  %v1378_v13 = vadd.f32 %v1377_v59, %v1376_v5  ;;  %v1383_v20 = vsel %vm296_vm0, %v3259_v57, 0.0 }
 0x272   : > { %v2091_v43 = vpop.eup %2090  ;;  %v1643_v1 = vadd.f32 %v2089_v11, %v1642_v56  ;;  %vm1663_vm1 = vcmp.lt.s32.totalorder %v3274_v14, 64  ;;  %vm1743_vm2 = vcmp.ge.s32.totalorder %v3274_v14, 64 }
 0x273   : > { %v1380_v3 = vadd.f32 %v1379_v48, %v1378_v13 }
 0x274   : > { %1198 = vadd.xlane.f32.xlu1 %v1197_v16  ;;  %v1644_v27 = vadd.f32 %v2091_v43, %v1643_v1  ;;  %v1206_v1 = vsel %vm296_vm0, %v3251_v26, 0.0 }
 0x275   : > { %v2093_v24 = vpop.eup %2092  ;;  %v1382_v42 = vadd.f32 %v1381_v39, %v1380_v3 }
 0x276   : > { %v1645_v2 = vrot.slane %v1644_v27, 4  ;;  %v1385_v55 = vsel %vm296_vm0, %v2093_v24, 0.0 }
 0x277   : > { %v1384_v41 = vadd.f32 %v1383_v20, %v1382_v42 }
 0x278   : > { %1201 = vadd.xlane.f32.xlu1 %v1200_v53  ;;  %v1646_v44 = vadd.f32 %v1645_v2, %v1644_v27 }
 0x279   : > { %v1386_v34 = vadd.f32 %v1385_v55, %v1384_v41 }
 0x27a   : > { %v1647_v60 = vrot.slane %v1646_v44, 2 }
 0x27b   : > { %v1387_v33 = vrot.slane %v1386_v34, 4 }
 0x27c   : > { %1204 = vadd.xlane.f32.xlu1 %v1203_v63  ;;  %v1648_v40 = vadd.f32 %v1647_v60, %v1646_v44  ;;  %v2098_v63 = vld [vmem:[%s3549_s1 + $0x18] sm:$0xff] }
 0x27d   : > { %v1388_v10 = vadd.f32 %v1387_v33, %v1386_v34  ;;  %v2099_v33 = vld [vmem:[%s3549_s1 + $0x8] sm:$0xff] }
 0x27e   : > { %v1649_v47 = vrot.slane %v1648_v40, 1 }
 0x27f   : > { %v1389_v25 = vrot.slane %v1388_v10, 2 }
 0x280   : > { %v1650_v52 = vadd.f32 %v1649_v47, %v1648_v40 }
 0x281   : > { %v1390_v50 = vadd.f32 %v1389_v25, %v1388_v10  ;;  %v2100_v25 = vld [vmem:[%s3549_s1 + $0x10] sm:$0xff] }
 0x282   : > { %2094 = vrcp.f32 %v1650_v52 }
 0x283   : > { %v1391_v19 = vrot.slane %v1390_v50, 1 }
 0x285   : > { %v1392_v46 = vadd.f32 %v1391_v19, %v1390_v50  ;;  %v2101_v19 = vld [vmem:[%s3549_s1] sm:$0xff] }
 0x287   : > { %2096 = vrcp.f32 %v1392_v46 }
 0x28c   : > { %v2095_v51 = vpop.eup %2094 }
 0x28d   : > { %v1653_v36 = vmul.f32 %v2095_v51, %v3223_v0  ;;  %v1652_v37 = vmul.f32 %v2095_v51, %v3219_v21  ;;  %v1654_v49 = vmul.f32 %v2095_v51, %v3227_v61  ;;  %v1655_v18 = vmul.f32 %v2095_v51, %v3239_v7 }
 0x28e   : > { %v1656_v32 = vmul.f32 %v2095_v51, %v2081_v8  ;;  %v1657_v54 = vmul.f32 %v2095_v51, %v2085_v58  ;;  %v1658_v62 = vmul.f32 %v2095_v51, %v2089_v11  ;;  %v1659_v15 = vmul.f32 %v2095_v51, %v2091_v43 }
 0x28f   : > { %v1668_v29 = vsel %vm1663_vm1, %v1653_v36, 0.0  ;;  %v1667_v28 = vsel %vm1663_vm1, %v1652_v37, 0.0  ;;  %v1749_v21 = vsel %vm1743_vm2, %v1653_v36, 0.0  ;;  %v1748_v61 = vsel %vm1743_vm2, %v1652_v37, 0.0  ;;  %v2103_v37 = vld [vmem:[%s3549_s1 + $0x20] sm:$0xff] }
 0x290   : > { %1677 = vadd.xlane.f32.xlu1 %v1668_v29  ;;  %1675 = vadd.xlane.f32.xlu0 %v1667_v28  ;;  %v1750_v56 = vsel %vm1743_vm2, %v1654_v49, 0.0  ;;  %v1673_v5 = vsel %vm1663_vm1, %v1658_v62, 0.0  ;;  %v1754_v16 = vsel %vm1743_vm2, %v1658_v62, 0.0  ;;  %v1755_v27 = vsel %vm1743_vm2, %v1659_v15, 0.0  ;;  %v2104_v29 = vld [vmem:[%s3549_s1 + $0x38] sm:$0xff] }
 0x291   : > { %v2097_v0 = vpop.eup %2096 }
 0x292   : > { %v1395_v7 = vmul.f32 %v2097_v0, %v3233_v17  ;;  %v1396_v8 = vmul.f32 %v2097_v0, %v3217_v30  ;;  %v1394_v4 = vmul.f32 %v2097_v0, %v3215_v23  ;;  %v1397_v31 = vmul.f32 %v2097_v0, %v3221_v45 }
 0x293   : > { %v1398_v58 = vmul.f32 %v2097_v0, %v3245_v35  ;;  %v1399_v12 = vmul.f32 %v2097_v0, %v3253_v6  ;;  %v1400_v38 = vmul.f32 %v2097_v0, %v3259_v57  ;;  %v1401_v9 = vmul.f32 %v2097_v0, %v2093_v24 }
 0x294   : > { %1758 = vadd.xlane.f32.xlu1 %v1749_v21  ;;  %1756 = vadd.xlane.f32.xlu0 %v1748_v61  ;;  %v1669_v17 = vsel %vm1663_vm1, %v1654_v49, 0.0  ;;  %v1751_v23 = vsel %vm1743_vm2, %v1655_v18, 0.0  ;;  %v1670_v30 = vsel %vm1663_vm1, %v1655_v18, 0.0  ;;  %v1752_v45 = vsel %vm1743_vm2, %v1656_v32, 0.0 }
 0x295   : > { %v1671_v35 = vsel %vm1663_vm1, %v1656_v32, 0.0  ;;  %v1753_v6 = vsel %vm1743_vm2, %v1657_v54, 0.0  ;;  %v1672_v57 = vsel %vm1663_vm1, %v1657_v54, 0.0  ;;  %v1405_v11 = vsel %vm296_vm0, %v1395_v7, 0.0 }
 0x296   : > { %v1408_v59 = vsel %vm296_vm0, %v1396_v8, 0.0  ;;  %v1402_v43 = vsel %vm296_vm0, %v1394_v4, 0.0  ;;  %v1411_v13 = vsel %vm296_vm0, %v1397_v31, 0.0  ;;  %v1414_v48 = vsel %vm296_vm0, %v1398_v58, 0.0  ;;  %v2105_v8 = vld [vmem:[%s3549_s1 + $0x30] sm:$0xff]  ;;  %v2106_v31 = vld [vmem:[%s3549_s1 + $0x48] sm:$0xff] }
 0x297   : > { %v1417_v3 = vsel %vm296_vm0, %v1399_v12, 0.0  ;;  %v1420_v26 = vsel %vm296_vm0, %v1400_v38, 0.0  ;;  %v1423_v39 = vsel %vm296_vm0, %v1401_v9, 0.0  ;;  %v1674_v24 = vsel %vm1663_vm1, %v1659_v15, 0.0  ;;  %v2107_v38 = vld [vmem:[%s3549_s1 + $0x40] sm:$0xff] }
 0x298   : > { %1760 = vadd.xlane.f32.xlu1 %v1750_v56  ;;  %1679 = vadd.xlane.f32.xlu0 %v1669_v17  ;;  %v2108_v17 = vld [vmem:[%s3549_s1 + $0x58] sm:$0xff] }
 0x29c   : > { %1762 = vadd.xlane.f32.xlu1 %v1751_v23  ;;  %1681 = vadd.xlane.f32.xlu0 %v1670_v30 }
 0x2a0   : > { %1764 = vadd.xlane.f32.xlu1 %v1752_v45  ;;  %1683 = vadd.xlane.f32.xlu0 %v1671_v35 }
 0x2a4   : > { %1766 = vadd.xlane.f32.xlu1 %v1753_v6  ;;  %1685 = vadd.xlane.f32.xlu0 %v1672_v57  ;;  %v2109_v57 = vld [vmem:[%s3549_s1 + $0x50] sm:$0xff] }
 0x2a8   : > { %1687 = vadd.xlane.f32.xlu0 %v1673_v5  ;;  %1406 = vadd.xlane.f32.xlu1 %v1405_v11 }
 0x2ac   : > { %1409 = vadd.xlane.f32.xlu1 %v1408_v59  ;;  %1403 = vadd.xlane.f32.xlu0 %v1402_v43  ;;  %v2110_v43 = vld [vmem:[%s3549_s1 + $0x68] sm:$0xff] }
 0x2b0   : > { %1207 = vadd.xlane.f32.xlu1 %v1206_v1  ;;  %1412 = vadd.xlane.f32.xlu0 %v1411_v13 }
 0x2b4   : > { %1768 = vadd.xlane.f32.xlu1 %v1754_v16  ;;  %1415 = vadd.xlane.f32.xlu0 %v1414_v48 }
 0x2b8   : > { %1770 = vadd.xlane.f32.xlu1 %v1755_v27  ;;  %1418 = vadd.xlane.f32.xlu0 %v1417_v3  ;;  %v2111_v27 = vld [vmem:[%s3549_s1 + $0x60] sm:$0xff] }
 0x2bc   : > { %1421 = vadd.xlane.f32.xlu0 %v1420_v26  ;;  %v2112_v26 = vld [vmem:[%s2231_s29 + $0x18] sm:$0xff] }
 0x2c0   : > { %1424 = vadd.xlane.f32.xlu0 %v1423_v39 }
 0x2c4   : > { %1689 = vadd.xlane.f32.xlu0 %v1674_v24  ;;  %v2113_v24 = vld [vmem:[%s2231_s29 + $0x8] sm:$0xff] }
 0x2f9   : > { %v1190_v2 = vpop.xlane.xlu1 %1189  ;;  %v1187_v53 = vpop.xlane.xlu0 %1186 }
 0x2fa   : > { %v1212_v40 = vmul.f32 %v2098_v63, %v1190_v2  ;;  %v1210_v47 = vmul.f32 %v2099_v33, %v1187_v53  ;;  %v1211_v50 = vmul.f32 %v2100_v25, %v1190_v2  ;;  %v1209_v46 = vmul.f32 %v2101_v19, %v1187_v53 }
 0x2fc   : > { %v1239_v51 = vsel %vm296_vm0, %v1212_v40, 0.0  ;;  %v1238_v36 = vsel %vm296_vm0, %v1210_v47, 0.0  ;;  %v1225_v54 = vadd.f32 %v1211_v50, %v1209_v46  ;;  %v2115_v40 = vld [vmem:[%s2231_s29] sm:$0xff]  ;;  %v2116_v50 = vld [vmem:[%s2231_s29 + $0x28] sm:$0xff] }
 0x2fd   : > { %v1196_v42 = vpop.xlane.xlu1 %1195  ;;  %v1193_v41 = vpop.xlane.xlu0 %1192  ;;  %v1240_v15 = vadd.f32 %v1239_v51, %v1238_v36 }
 0x2fe   : > { %v1214_v14 = vmul.f32 %v2102_v22, %v1193_v41  ;;  %v1213_v49 = vmul.f32 %v2103_v37, %v1193_v41  ;;  %v1216_v28 = vmul.f32 %v2104_v29, %v1196_v42  ;;  %v1215_v4 = vmul.f32 %v2105_v8, %v1196_v42  ;;  %v2114_v41 = vld [vmem:[%s2231_s29 + $0x10] sm:$0xff] }
 0x300   : > { %v1241_v62 = vsel %vm296_vm0, %v1214_v14, 0.0  ;;  %v1226_v0 = vadd.f32 %v1225_v54, %v1213_v49  ;;  %v1243_v12 = vsel %vm296_vm0, %v1216_v28, 0.0  ;;  %v2118_v49 = vld [vmem:[%s2231_s29 + $0x38] sm:$0xff] }
 0x301   : > { %v1199_v20 = vpop.xlane.xlu1 %1198  ;;  %v1242_v7 = vadd.f32 %v1241_v62, %v1240_v15 }
 0x302   : > { %v1218_v58 = vmul.f32 %v2106_v31, %v1199_v20  ;;  %v1217_v9 = vmul.f32 %v2107_v38, %v1199_v20  ;;  %v1227_v56 = vadd.f32 %v1226_v0, %v1215_v4  ;;  %v2119_v4 = vld [vmem:[%s2231_s29 + $0x30] sm:$0xff] }
 0x303   : > { %v1244_v35 = vadd.f32 %v1243_v12, %v1242_v7 }
 0x304   : > { %v1245_v6 = vsel %vm296_vm0, %v1218_v58, 0.0  ;;  %v1228_v11 = vadd.f32 %v1227_v56, %v1217_v9 }
 0x305   : > { %v1202_v44 = vpop.xlane.xlu1 %1201  ;;  %v1246_v48 = vadd.f32 %v1245_v6, %v1244_v35  ;;  %v2121_v35 = vld [vmem:[%s2231_s29 + $0x48] sm:$0xff] }
 0x306   : > { %v1220_v23 = vmul.f32 %v2108_v17, %v1202_v44  ;;  %v1219_v5 = vmul.f32 %v2109_v57, %v1202_v44 }
 0x308   : > { %v1247_v59 = vsel %vm296_vm0, %v1220_v23, 0.0  ;;  %v1229_v53 = vadd.f32 %v1228_v11, %v1219_v5 }
 0x309   : > { %v1205_v55 = vpop.xlane.xlu1 %1204  ;;  %v1248_v44 = vadd.f32 %v1247_v59, %v1246_v48  ;;  %v2123_v59 = vld [vmem:[%s3549_s1 + $0x98] sm:$0xff] }
 0x30a   : > { %v1222_v1 = vmul.f32 %v2110_v43, %v1205_v55  ;;  %v1221_v3 = vmul.f32 %v2111_v27, %v1205_v55  ;;  %v3442_v27 = vld [vmem:[%s2231_s29 + $0x58] sm:$0xff] }
 0x30c   : > { %v1249_v55 = vsel %vm296_vm0, %v1222_v1, 0.0  ;;  %v3409_v14 = vadd.f32 %v1229_v53, %v1221_v3  ;;  %v2126_v53 = vld [vmem:[%s2231_s29 + $0x40] sm:$0xff] }
 0x30d   : > { %v3419_v62 = vadd.f32 %v1249_v55, %v1248_v44 }
 0x31d   : > { %v3331_v60 = vpop.xlane.xlu1 %1677  ;;  %v3333_v34 = vpop.xlane.xlu0 %1675 }
 0x31e   : > { %v1694_v39 = vmul.f32 %v2112_v26, %v3331_v60  ;;  %v1692_v2 = vmul.f32 %v2113_v24, %v3333_v34  ;;  %v1693_v63 = vmul.f32 %v2114_v41, %v3331_v60  ;;  %v1691_v33 = vmul.f32 %v2115_v40, %v3333_v34 }
 0x320   : > { %v1721_v51 = vsel %vm296_vm0, %v1694_v39, 0.0  ;;  %v1720_v60 = vsel %vm296_vm0, %v1692_v2, 0.0  ;;  %v1707_v15 = vadd.f32 %v1693_v63, %v1691_v33 }
 0x321   : > { %v1759_v10 = vpop.xlane.xlu1 %1758  ;;  %v1757_v52 = vpop.xlane.xlu0 %1756  ;;  %v1722_v0 = vadd.f32 %v1721_v51, %v1720_v60 }
 0x322   : > { %v1775_v42 = vmul.f32 %v2112_v26, %v1759_v10  ;;  %v1773_v20 = vmul.f32 %v2113_v24, %v1757_v52  ;;  %v1774_v47 = vmul.f32 %v2114_v41, %v1759_v10  ;;  %v1772_v25 = vmul.f32 %v2115_v40, %v1757_v52  ;;  %v2117_v10 = vld [vmem:[%s2231_s29 + $0x20] sm:$0xff]  ;;  %v2125_v26 = vld [vmem:[%s3549_s1 + $0x90] sm:$0xff] }
 0x324   : > { %v1802_v34 = vsel %vm296_vm0, %v1775_v42, 0.0  ;;  %v1801_v37 = vsel %vm296_vm0, %v1773_v20, 0.0  ;;  %v1788_v7 = vadd.f32 %v1774_v47, %v1772_v25  ;;  %v3459_v47 = vld [vmem:[%s2231_s29 + $0x50] sm:$0xff] }
 0x325   : > { %v1761_v18 = vpop.xlane.xlu1 %1760  ;;  %v3355_v32 = vpop.xlane.xlu0 %1679  ;;  %v1803_v12 = vadd.f32 %v1802_v34, %v1801_v37  ;;  %v2131_v37 = vld [vmem:[%s3549_s1 + $0x70] sm:$0xff] }
 0x326   : > { %v1777_v19 = vmul.f32 %v2116_v50, %v1761_v18  ;;  %v1696_v36 = vmul.f32 %v2116_v50, %v3355_v32  ;;  %v1776_v52 = vmul.f32 %v2117_v10, %v1761_v18  ;;  %v1695_v29 = vmul.f32 %v2117_v10, %v3355_v32  ;;  %v2120_v32 = vld [vmem:[%s3549_s1 + $0x88] sm:$0xff] }
 0x328   : > { %v1804_v8 = vsel %vm296_vm0, %v1777_v19, 0.0  ;;  %v1723_v38 = vsel %vm296_vm0, %v1696_v36, 0.0  ;;  %v1789_v17 = vadd.f32 %v1788_v7, %v1776_v52 }
 0x329   : > { %v3361_v21 = vpop.xlane.xlu1 %1762  ;;  %v3363_v61 = vpop.xlane.xlu0 %1681  ;;  %v1805_v5 = vadd.f32 %v1804_v8, %v1803_v12  ;;  %v1724_v1 = vadd.f32 %v1723_v38, %v1722_v0  ;;  %v2133_v0 = vld [vmem:[%s2231_s29 + $0x68] sm:$0xff] }
 0x32a   : > { %v1779_v54 = vmul.f32 %v2118_v49, %v3361_v21  ;;  %v1698_v28 = vmul.f32 %v2118_v49, %v3363_v61  ;;  %v1778_v31 = vmul.f32 %v2119_v4, %v3361_v21  ;;  %v1697_v9 = vmul.f32 %v2119_v4, %v3363_v61  ;;  %v2122_v21 = vld [vmem:[%s3549_s1 + $0x80] sm:$0xff] }
 0x32b   : > { %v1708_v61 = vadd.f32 %v1707_v15, %v1695_v29  ;;  %v2132_v29 = vld [vmem:[%s2231_s29 + $0x60] sm:$0xff] }
 0x32c   : > { %v1806_v23 = vsel %vm296_vm0, %v1779_v54, 0.0  ;;  %v1725_v11 = vsel %vm296_vm0, %v1698_v28, 0.0  ;;  %v1790_v48 = vadd.f32 %v1789_v17, %v1778_v31  ;;  %v2134_v31 = vld [vmem:[%s3549_s1 + $0xb0] sm:$0xff] }
 0x32d   : > { %v3378_v30 = vpop.xlane.xlu1 %1764  ;;  %v3380_v45 = vpop.xlane.xlu0 %1683  ;;  %v1807_v42 = vadd.f32 %v1806_v23, %v1805_v5  ;;  %v3449_v20 = vadd.f32 %v1708_v61, %v1697_v9  ;;  %v3454_v63 = vadd.f32 %v1725_v11, %v1724_v1  ;;  %v2137_v61 = vld [vmem:[%s3549_s1 + $0xc0] sm:$0xff]  ;;  %v2139_v1 = vld [vmem:[%s2231_s29 + $0x78] sm:$0xff] }
 0x32e   : > { %v1781_v6 = vmul.f32 %v2121_v35, %v3378_v30  ;;  %v1780_v44 = vmul.f32 %v2126_v53, %v3378_v30  ;;  %v1699_v33 = vmul.f32 %v2126_v53, %v3380_v45  ;;  %v2128_v30 = vld [vmem:[%s3549_s1 + $0xa8] sm:$0xff]  ;;  %v1700_v8 = vmul.f32 %v2121_v35, %v3380_v45 }
 0x32f   : > { %v2136_v35 = vld [vmem:[%s3549_s1 + $0xc8] sm:$0xff] }
 0x330   : > { %v1808_v40 = vsel %vm296_vm0, %v1781_v6, 0.0  ;;  %v1791_v54 = vadd.f32 %v1790_v48, %v1780_v44  ;;  %v2141_v44 = vld [vmem:[%s3549_s1 + $0xd0] sm:$0xff] }
 0x331   : > { %v3390_v13 = vpop.xlane.xlu1 %1766  ;;  %v3392_v16 = vpop.xlane.xlu0 %1685  ;;  %v1809_v15 = vadd.f32 %v1808_v40, %v1807_v42  ;;  %v1710_v40 = vadd.f32 %v3449_v20, %v1699_v33  ;;  %v2143_v33 = vld [vmem:[%s3549_s1 + $0xe8] sm:$0xff] }
 0x332   : > { %v1783_v3 = vmul.f32 %v3442_v27, %v3390_v13  ;;  %v1782_v25 = vmul.f32 %v3459_v47, %v3390_v13  ;;  %v2130_v13 = vld [vmem:[%s3549_s1 + $0xa0] sm:$0xff] }
 0x334   : > { %v1810_v60 = vsel %vm296_vm0, %v1783_v3, 0.0  ;;  %v1792_v38 = vadd.f32 %v1791_v54, %v1782_v25 }
 0x335   : > { %v1407_v46 = vpop.xlane.xlu1 %1406  ;;  %v3407_v22 = vpop.xlane.xlu0 %1687  ;;  %v1811_v9 = vadd.f32 %v1810_v60, %v1809_v15 }
 0x336   : > { %v1429_v43 = vmul.f32 %v2123_v59, %v1407_v46  ;;  %v1428_v39 = vmul.f32 %v2125_v26, %v1407_v46  ;;  %v2129_v46 = vld [vmem:[%s3549_s1 + $0x78] sm:$0xff]  ;;  %v2138_v59 = vld [vmem:[%s2231_s29 + $0x70] sm:$0xff]  ;;  %v1703_v54 = vmul.f32 %v2132_v29, %v3407_v22  ;;  %v1704_v15 = vmul.f32 %v2133_v0, %v3407_v22 }
 0x337   : > { %v2145_v22 = vld [vmem:[%s3549_s1 + $0xf8] sm:$0xff] }
 0x338   : > { %v1456_v50 = vsel %vm296_vm0, %v1429_v43, 0.0 }
 0x339   : > { %v1410_v58 = vpop.xlane.xlu1 %1409  ;;  %v1404_v18 = vpop.xlane.xlu0 %1403 }
 0x33a   : > { %v1427_v56 = vmul.f32 %v2120_v32, %v1404_v18  ;;  %v1426_v57 = vmul.f32 %v2122_v21, %v1404_v18  ;;  %v1431_v19 = vmul.f32 %v2128_v30, %v1410_v58  ;;  %v1430_v36 = vmul.f32 %v2130_v13, %v1410_v58  ;;  %v2135_v18 = vld [vmem:[%s3549_s1 + $0xb8] sm:$0xff] }
 0x33b   : > { %v1701_v13 = vmul.f32 %v3459_v47, %v3392_v16 }
 0x33c   : > { %v1455_v41 = vsel %vm296_vm0, %v1427_v56, 0.0  ;;  %v1442_v55 = vadd.f32 %v1428_v39, %v1426_v57  ;;  %v1458_v32 = vsel %vm296_vm0, %v1431_v19, 0.0  ;;  %v2140_v39 = vld [vmem:[%s3549_s1 + $0xd8] sm:$0xff] }
 0x33d   : > { %v1208_v24 = vpop.xlane.xlu1 %1207  ;;  %v1413_v2 = vpop.xlane.xlu0 %1412  ;;  %v1457_v34 = vadd.f32 %v1456_v50, %v1455_v41 }
 0x33e   : > { %v1224_v51 = vmul.f32 %v2129_v46, %v1208_v24  ;;  %v1223_v10 = vmul.f32 %v2131_v37, %v1208_v24  ;;  %v1443_v4 = vadd.f32 %v1442_v55, %v1430_v36  ;;  %v1432_v58 = vmul.f32 %v2134_v31, %v1413_v2 }
 0x33f   : > { %v1433_v12 = vmul.f32 %v2135_v18, %v1413_v2  ;;  %v1459_v17 = vadd.f32 %v1458_v32, %v1457_v34  ;;  %v1702_v37 = vmul.f32 %v3442_v27, %v3392_v16  ;;  %v1711_v27 = vadd.f32 %v1710_v40, %v1701_v13 }
 0x340   : > { %v1251_v56 = vsel %vm296_vm0, %v1224_v51, 0.0  ;;  %v1231_v45 = vadd.f32 %v3409_v14, %v1223_v10  ;;  %v1444_v3 = vadd.f32 %v1443_v4, %v1432_v58  ;;  %v2142_v51 = vld [vmem:[%s3549_s1 + $0xe0] sm:$0xff]  ;;  %v2144_v58 = vld [vmem:[%s3549_s1 + $0xf0] sm:$0xff] }
 0x341   : > { %v1769_v52 = vpop.xlane.xlu1 %1768  ;;  %v1416_v49 = vpop.xlane.xlu0 %1415  ;;  %v1252_v48 = vadd.f32 %v1251_v56, %v3419_v62  ;;  %v1460_v26 = vsel %vm296_vm0, %v1433_v12, 0.0  ;;  %v1727_v62 = vsel %vm296_vm0, %v1700_v8, 0.0  ;;  %v1712_v56 = vadd.f32 %v1711_v27, %v1703_v54 }
 0x342   : > { %v1784_v28 = vmul.f32 %v2132_v29, %v1769_v52  ;;  %v1785_v7 = vmul.f32 %v2133_v0, %v1769_v52  ;;  %v1435_v6 = vmul.f32 %v2136_v35, %v1416_v49  ;;  %v1434_v11 = vmul.f32 %v2137_v61, %v1416_v49 }
 0x343   : > { %v1232_v55 = vrot.slane %v1231_v45, 4  ;;  %v1461_v30 = vadd.f32 %v1460_v26, %v1459_v17  ;;  %v1253_v36 = vrot.slane %v1252_v48, 4  ;;  %v1728_v16 = vadd.f32 %v1727_v62, %v3454_v63 }
 0x344   : > { %v1812_v23 = vsel %vm296_vm0, %v1785_v7, 0.0  ;;  %v1793_v5 = vadd.f32 %v1792_v38, %v1784_v28  ;;  %v1462_v25 = vsel %vm296_vm0, %v1435_v6, 0.0  ;;  %v1445_v19 = vadd.f32 %v1444_v3, %v1434_v11 }
 0x345   : > { %v1771_v21 = vpop.xlane.xlu1 %1770  ;;  %v1419_v57 = vpop.xlane.xlu0 %1418  ;;  %v1813_v2 = vadd.f32 %v1812_v23, %v1811_v9  ;;  %v1463_v10 = vadd.f32 %v1462_v25, %v1461_v30  ;;  %v1233_v28 = vadd.f32 %v1232_v55, %v1231_v45  ;;  %v1254_v12 = vadd.f32 %v1253_v36, %v1252_v48 }
 0x346   : > { %v1786_v43 = vmul.f32 %v2138_v59, %v1771_v21  ;;  %v1787_v14 = vmul.f32 %v2139_v1, %v1771_v21  ;;  %v1437_v24 = vmul.f32 %v2140_v39, %v1419_v57  ;;  %v1436_v41 = vmul.f32 %v2141_v44, %v1419_v57 }
 0x347   : > { %v1729_v0 = vsel %vm296_vm0, %v1702_v37, 0.0  ;;  %v1731_v45 = vsel %vm296_vm0, %v1704_v15, 0.0  ;;  %v1234_v17 = vrot.slane %v1233_v28, 2  ;;  %v1255_v61 = vrot.slane %v1254_v12, 2 }
 0x348   : > { %v1794_v42 = vadd.f32 %v1793_v5, %v1786_v43  ;;  %v1814_v53 = vsel %vm296_vm0, %v1787_v14, 0.0  ;;  %v1464_v20 = vsel %vm296_vm0, %v1437_v24, 0.0  ;;  %v1446_v49 = vadd.f32 %v1445_v19, %v1436_v41 }
 0x349   : > { %v1422_v50 = vpop.xlane.xlu0 %1421  ;;  %v1815_v46 = vadd.f32 %v1814_v53, %v1813_v2  ;;  %v1465_v4 = vadd.f32 %v1464_v20, %v1463_v10  ;;  %v1730_v5 = vadd.f32 %v1729_v0, %v1728_v16  ;;  %v1235_v39 = vadd.f32 %v1234_v17, %v1233_v28 }
 0x34a   : > { %v1438_v60 = vmul.f32 %v2142_v51, %v1422_v50  ;;  %v1439_v34 = vmul.f32 %v2143_v33, %v1422_v50  ;;  %v1795_v52 = vrot.slane %v1794_v42, 4  ;;  %v1256_v41 = vadd.f32 %v1255_v61, %v1254_v12 }
 0x34b   : > { %v1816_v8 = vrot.slane %v1815_v46, 4  ;;  %v1732_v26 = vadd.f32 %v1731_v45, %v1730_v5  ;;  %v1236_v50 = vrot.slane %v1235_v39, 1 }
 0x34c   : > { %v1466_v47 = vsel %vm296_vm0, %v1439_v34, 0.0  ;;  %v1447_v31 = vadd.f32 %v1446_v49, %v1438_v60  ;;  %v1796_v38 = vadd.f32 %v1795_v52, %v1794_v42  ;;  %v1257_v60 = vrot.slane %v1256_v41, 1 }
 0x34d   : > { %v1425_v7 = vpop.xlane.xlu0 %1424  ;;  %v1467_v9 = vadd.f32 %v1466_v47, %v1465_v4  ;;  %v1817_v63 = vadd.f32 %v1816_v8, %v1815_v46  ;;  %v1237_v37 = vadd.f32 %v1236_v50, %v1235_v39 }
 0x34e   : > { %v1440_v18 = vmul.f32 %v2144_v58, %v1425_v7  ;;  %v1441_v29 = vmul.f32 %v2145_v22, %v1425_v7  ;;  %v1797_v43 = vrot.slane %v1796_v38, 2  ;;  %v1258_v47 = vadd.f32 %v1257_v60, %v1256_v41 }
 0x34f   : > { %v1818_v2 = vrot.slane %v1817_v63, 2  ;;  %v1259_v4 = vmul.f32 0.015625, %v1237_v37 }
 0x350   : > { %v1448_v32 = vadd.f32 %v1447_v31, %v1440_v18  ;;  %v1468_v23 = vsel %vm296_vm0, %v1441_v29, 0.0  ;;  %v1798_v62 = vadd.f32 %v1797_v43, %v1796_v38  ;;  %v1260_v22 = vmul.f32 0.015625, %v1258_v47 }
 0x351   : > { %v1690_v35 = vpop.xlane.xlu0 %1689  ;;  %v1469_v21 = vadd.f32 %v1468_v23, %v1467_v9  ;;  %v1819_v30 = vadd.f32 %v1818_v2, %v1817_v63 }
 0x352   : > { %v1449_v6 = vrot.slane %v1448_v32, 4  ;;  %v1705_v57 = vmul.f32 %v2138_v59, %v1690_v35  ;;  %v1706_v11 = vmul.f32 %v2139_v1, %v1690_v35  ;;  %v1799_v36 = vrot.slane %v1798_v62, 1 }
 0x353   : > { %v1470_v48 = vrot.slane %v1469_v21, 4  ;;  %v1820_v52 = vrot.slane %v1819_v30, 1 }
 0x354   : > { %v1450_v14 = vadd.f32 %v1449_v6, %v1448_v32  ;;  %v1713_v3 = vadd.f32 %v1712_v56, %v1705_v57  ;;  %v1733_v24 = vsel %vm296_vm0, %v1706_v11, 0.0  ;;  %v1800_v7 = vadd.f32 %v1799_v36, %v1798_v62 }
 0x355   : > { %v1471_v53 = vadd.f32 %v1470_v48, %v1469_v21  ;;  %v1734_v40 = vadd.f32 %v1733_v24, %v1732_v26  ;;  %v1821_v58 = vadd.f32 %v1820_v52, %v1819_v30 }
 0x356   : > { %v1451_v42 = vrot.slane %v1450_v14, 2  ;;  %v1714_v44 = vrot.slane %v1713_v3, 4  ;;  %v1822_v29 = vmul.f32 0.015625, %v1800_v7 }
 0x357   : > { %v1472_v59 = vrot.slane %v1471_v53, 2  ;;  %v1735_v1 = vrot.slane %v1734_v40, 4  ;;  %v1823_v9 = vmul.f32 0.015625, %v1821_v58 }
 0x358   : > { %v1452_v55 = vadd.f32 %v1451_v42, %v1450_v14  ;;  %v1715_v25 = vadd.f32 %v1714_v44, %v1713_v3 }
 0x359   : > { %v1473_v46 = vadd.f32 %v1472_v59, %v1471_v53  ;;  %v1736_v13 = vadd.f32 %v1735_v1, %v1734_v40 }
 0x35a   : > { %v1453_v19 = vrot.slane %v1452_v55, 1  ;;  %v1716_v51 = vrot.slane %v1715_v25, 2 }
 0x35b   : > { %v1474_v33 = vrot.slane %v1473_v46, 1  ;;  %v1737_v10 = vrot.slane %v1736_v13, 2 }
 0x35c   : > { %v1454_v20 = vadd.f32 %v1453_v19, %v1452_v55  ;;  %v1717_v34 = vadd.f32 %v1716_v51, %v1715_v25 }
 0x35d   : > { %v1475_v49 = vadd.f32 %v1474_v33, %v1473_v46  ;;  %v1738_v28 = vadd.f32 %v1737_v10, %v1736_v13 }
 0x35e   : > { %v1718_v54 = vrot.slane %v1717_v34, 1  ;;  %v1476_v15 = vmul.f32 0.015625, %v1454_v20 }
 0x35f   : > { %v1739_v31 = vrot.slane %v1738_v28, 1  ;;  %v1477_v18 = vmul.f32 0.015625, %v1475_v49 }
 0x360   : > { %v1719_v8 = vadd.f32 %v1718_v54, %v1717_v34  ;;  %v1825_v27 = vsel %vm1824_vm3, %v1259_v4, %v1476_v15 }
 0x361   : > { %v1740_v12 = vadd.f32 %v1739_v31, %v1738_v28  ;;  %v1826_v32 = vsel %vm1824_vm3, %v1260_v22, %v1477_v18 }
 0x362   : > { %v1741_v16 = vmul.f32 0.015625, %v1719_v8 }
 0x363   : > { %v1742_v38 = vmul.f32 0.015625, %v1740_v12 }
 0x364   : > { %v1828_v0 = vsel %vm1827_vm4, %v1825_v27, %v1741_v16 }
 0x365   : > { %v1831_v56 = vsel %vm1830_vm5, %v1828_v0, %v1822_v29  ;;  %v1829_v45 = vsel %vm1827_vm4, %v1826_v32, %v1742_v38 }
 0x366   : > { %v1832_v17 = vsel %vm1830_vm5, %v1829_v45, %v1823_v9 }
 0x367   : > { %v1835_v23 = vcombine.low %v1831_v56, %v1832_v17 }
 0x369   : > { %1840 = vst.msk [vmem:[%s170_s5] sm:$0xff] %vm1839_vm8, %v1835_v23 }
 0x36a PF: > { %s13_s12 = sadd.s32 1, %s2152_s12  }
 0x36b   : > { %p10_p4 = scmp.ge.s32.totalorder %s13_s12, 4  }
 0x36d   :  { %12 = sbr.rel (!%p10_p4) target bundleno = 1 (0x1), region = 63 }

</bundles_post_ra>
